<compile_context>
chip_gen: v7x
topology: tpu7x:2x2x1
jax: 0.10.0
libtpu: 0.0.40
codegen_flags: <defaults>
</compile_context>

<pallas_src>
import functools

import jax
import jax.numpy as jnp
from jax import lax
from jax.experimental import pallas as pl
from jax.experimental.pallas import tpu as pltpu

# Layer sizes of the PyTorch Mnist_NN (784 -> 128 -> 256 -> 10).
D_IN = 784
D_H1 = 128
D_H2 = 256
D_OUT = 10


def mnist_mlp_kernel(x_ref, w1_ref, b1_ref, w2_ref, b2_ref, w3_ref, b3_ref,
                     o_ref, *, compute_dtype, precision):
    # In-kernel cast of x (VPU work hidden under the x DMA) -- avoids an extra
    # full HBM pass over the activation stream in the wrapper.
    x = x_ref[...].astype(compute_dtype)

    # MXU matmuls in compute_dtype with f32 accumulation; bias-add / ReLU stay
    # in f32 (v5e VPU has no bf16).
    h1 = jnp.dot(x, w1_ref[...],
                 preferred_element_type=jnp.float32, precision=precision)
    h1 = jnp.maximum(h1 + b1_ref[...], 0.0)

    h2 = jnp.dot(h1.astype(compute_dtype), w2_ref[...],
                 preferred_element_type=jnp.float32, precision=precision)
    h2 = jnp.maximum(h2 + b2_ref[...], 0.0)

    out = jnp.dot(h2.astype(compute_dtype), w3_ref[...],
                  preferred_element_type=jnp.float32, precision=precision)
    o_ref[...] = out + b3_ref[...]


def mnist_nn_forward(x, params, *, batch_tile=None, compute_dtype=jnp.bfloat16):
    """Forward pass of Mnist_NN.  x: (B, 784) float32 -> (B, 10) float32."""
    w1, b1, w2, b2, w3, b3 = params
    B, d_in = x.shape
    assert d_in == D_IN

    if batch_tile is None:
        # At least 2 grid steps so both v7x TensorCores get work; cap at 1024
        # rows (keeps f32 tiles comfortably inside v5e/v7x VMEM limits).
        batch_tile = min(1024, max(8, 8 * pl.cdiv(pl.cdiv(B, 2), 8)))
    assert batch_tile % 8 == 0, "batch_tile must be a multiple of 8 (sublane)"

    grid = (pl.cdiv(B, batch_tile),)   # ragged last block handled by Pallas

    # True-f32 matmul when requested (default TPU precision truncates operands
    # to bf16 on the MXU); the extra MXU passes are free under the x DMA.
    if jnp.dtype(compute_dtype) == jnp.dtype(jnp.float32):
        precision = lax.Precision.HIGHEST
    else:
        precision = None

    # Weights are tiny -- a one-time wrapper cast is cheap.  x itself is NOT
    # touched in the wrapper (no pad, no cast): it is streamed straight from
    # HBM and cast inside the kernel.
    w1_c = w1.astype(compute_dtype)
    w2_c = w2.astype(compute_dtype)
    w3_c = w3.astype(compute_dtype)
    b1_c = b1.astype(jnp.float32)
    b2_c = b2.astype(jnp.float32)
    b3_c = b3.astype(jnp.float32)

    w_bytes = jnp.dtype(compute_dtype).itemsize
    weight_elems = D_IN * D_H1 + D_H1 * D_H2 + D_H2 * D_OUT
    cost = pl.CostEstimate(
        flops=2 * B * weight_elems,
        transcendentals=0,
        bytes_accessed=(B * D_IN * x.dtype.itemsize   # x in
                        + weight_elems * w_bytes      # weights in
                        + B * D_OUT * 4),             # output
    )

    kernel = functools.partial(
        mnist_mlp_kernel, compute_dtype=compute_dtype, precision=precision)

    return pl.pallas_call(
        kernel,
        out_shape=jax.ShapeDtypeStruct((B, D_OUT), jnp.float32),
        grid_spec=pltpu.PrefetchScalarGridSpec(
            num_scalar_prefetch=0,
            grid=grid,
            in_specs=[
                # x: the only operand tiled over batch.  Last dim = full array
                # dim (784), so no (8,128) issue and no padding needed.
                pl.BlockSpec((batch_tile, D_IN), lambda i: (i, 0)),
                # Weights / biases: grid-invariant full blocks (constant
                # index_map -> fetched once, not re-DMAed per step).
                pl.BlockSpec((D_IN, D_H1), lambda i: (0, 0)),
                pl.BlockSpec((1, D_H1), lambda i: (0, 0)),
                pl.BlockSpec((D_H1, D_H2), lambda i: (0, 0)),
                pl.BlockSpec((1, D_H2), lambda i: (0, 0)),
                pl.BlockSpec((D_H2, D_OUT), lambda i: (0, 0)),
                pl.BlockSpec((1, D_OUT), lambda i: (0, 0)),
            ],
            # Direct (batch_tile, 10) output: masked vst is hidden under the
            # x DMA in this memory-bound kernel; avoids padded writes + slice.
            out_specs=pl.BlockSpec((batch_tile, D_OUT), lambda i: (i, 0)),
        ),
        compiler_params=pltpu.CompilerParams(
            dimension_semantics=("parallel",),        # megacore over batch tiles
            vmem_limit_bytes=32 * 1024 * 1024,        # safe on v5e/v6e/v7x
        ),
        cost_estimate=cost,
    )(x, w1_c, b1_c, w2_c, b2_c, w3_c, b3_c)


def init_params(key):
    """Deterministic synthetic init with shapes matching Mnist_NN.__init__."""
    k1, k2, k3, k4, k5, k6 = jax.random.split(key, 6)
    # Stored as (in, out); equivalent to PyTorch's (out, in) weight transposed.
    w1 = jax.random.normal(k1, (D_IN, D_H1), jnp.float32) * 0.05
    b1 = jax.random.normal(k2, (1, D_H1), jnp.float32) * 0.05
    w2 = jax.random.normal(k3, (D_H1, D_H2), jnp.float32) * 0.05
    b2 = jax.random.normal(k4, (1, D_H2), jnp.float32) * 0.05
    w3 = jax.random.normal(k5, (D_H2, D_OUT), jnp.float32) * 0.05
    b3 = jax.random.normal(k6, (1, D_OUT), jnp.float32) * 0.05
    return (w1, b1, w2, b2, w3, b3)


def reference_forward(x, params):
    """Pure-JAX reference of the PyTorch forward, for correctness checking."""
    w1, b1, w2, b2, w3, b3 = params
    h1 = jnp.maximum(x @ w1 + b1, 0.0)
    h2 = jnp.maximum(h1 @ w2 + b2, 0.0)
    return h2 @ w3 + b3


if __name__ == "__main__":
    key = jax.random.PRNGKey(0)
    kx, kp = jax.random.split(key)

    batch = 200            # deliberately NOT a multiple of the batch tile
    x = jax.random.normal(kx, (batch, D_IN), jnp.float32)
    params = init_params(kp)

    ref = reference_forward(x, params)

    # Default path: bf16 matmul operands (MXU fast path on every generation),
    # f32 accumulation, adaptive batch tile (>=2 grid steps, ragged last block).
    fwd_bf16 = jax.jit(mnist_nn_forward)
    out_bf16 = jax.block_until_ready(fwd_bf16(x, params))
    assert out_bf16.shape == (batch, D_OUT)
    assert jnp.allclose(out_bf16, ref, atol=1e-1, rtol=1e-1), "bf16 mismatch vs reference"

    # True-f32 path (precision=HIGHEST on the MXU; cheap -- kernel is HBM-bound),
    # with an explicit tile to also exercise the user-specified-tile code path.
    fwd_f32 = jax.jit(functools.partial(
        mnist_nn_forward, batch_tile=128, compute_dtype=jnp.float32))
    out_f32 = jax.block_until_ready(fwd_f32(x, params))
    assert out_f32.shape == (batch, D_OUT)
    assert jnp.allclose(out_f32, ref, atol=1e-3, rtol=1e-3), "f32 mismatch vs reference"

    print("KERNEL_OK")
</pallas_src>

<mosaic_0001>
module attributes {stable_mosaic.version = 11 : i64} {
  func.func @mnist_mlp_kernel(%arg0: i32, %arg1: memref<104x784xf32, #tpu.memory_space<vmem>>, %arg2: memref<784x128xbf16, #tpu.memory_space<vmem>>, %arg3: memref<1x128xf32, #tpu.memory_space<vmem>>, %arg4: memref<128x256xbf16, #tpu.memory_space<vmem>>, %arg5: memref<1x256xf32, #tpu.memory_space<vmem>>, %arg6: memref<256x10xbf16, #tpu.memory_space<vmem>>, %arg7: memref<1x10xf32, #tpu.memory_space<vmem>>, %arg8: memref<104x10xf32, #tpu.memory_space<vmem>>) attributes {dimension_semantics = [#tpu.dimension_semantics<parallel>], iteration_bounds = array<i64: 2>, scalar_prefetch = 0 : i64, scratch_operands = 0 : i64, tpu.core_type = #tpu.core_type<tc>, window_params = [{transform_indices = @transform_0, window_bounds = array<i64: 104, 784>}, {pipeline_mode = #tpu.pipeline_mode<synchronous>, transform_indices = @transform_1, window_bounds = array<i64: 784, 128>}, {pipeline_mode = #tpu.pipeline_mode<synchronous>, transform_indices = @transform_2, window_bounds = array<i64: 1, 128>}, {pipeline_mode = #tpu.pipeline_mode<synchronous>, transform_indices = @transform_3, window_bounds = array<i64: 128, 256>}, {pipeline_mode = #tpu.pipeline_mode<synchronous>, transform_indices = @transform_4, window_bounds = array<i64: 1, 256>}, {pipeline_mode = #tpu.pipeline_mode<synchronous>, transform_indices = @transform_5, window_bounds = array<i64: 256, 10>}, {pipeline_mode = #tpu.pipeline_mode<synchronous>, transform_indices = @transform_6, window_bounds = array<i64: 1, 10>}, {transform_indices = @transform_7, window_bounds = array<i64: 104, 10>}]} {
    %c0 = arith.constant 0 : index
    %c0_0 = arith.constant 0 : index
    %0 = vector.load %arg1[%c0, %c0_0] : memref<104x784xf32, #tpu.memory_space<vmem>>, vector<104x784xf32>
    %1 = arith.truncf %0 : vector<104x784xf32> to vector<104x784xbf16>
    %c0_1 = arith.constant 0 : index
    %c0_2 = arith.constant 0 : index
    %2 = vector.load %arg2[%c0_1, %c0_2] : memref<784x128xbf16, #tpu.memory_space<vmem>>, vector<784x128xbf16>
    %cst = arith.constant dense<0.000000e+00> : vector<104x128xf32>
    %3 = tpu.matmul %1, %2, %cst {dimension_numbers = #tpu.dot_dimension_numbers<[1], [0], [0], [1], [0, 0, 1, 1], [], []>} : vector<104x784xbf16>, vector<784x128xbf16>, vector<104x128xf32> -> vector<104x128xf32>
    %c0_3 = arith.constant 0 : index
    %c0_4 = arith.constant 0 : index
    %4 = vector.load %arg3[%c0_3, %c0_4] : memref<1x128xf32, #tpu.memory_space<vmem>>, vector<1x128xf32>
    %5 = vector.broadcast %4 : vector<1x128xf32> to vector<104x128xf32>
    %6 = arith.addf %3, %5 : vector<104x128xf32>
    %cst_5 = arith.constant 0.000000e+00 : f32
    %7 = vector.broadcast %cst_5 : f32 to vector<104x128xf32>
    %8 = arith.maximumf %6, %7 : vector<104x128xf32>
    %9 = arith.truncf %8 : vector<104x128xf32> to vector<104x128xbf16>
    %c0_6 = arith.constant 0 : index
    %c0_7 = arith.constant 0 : index
    %10 = vector.load %arg4[%c0_6, %c0_7] : memref<128x256xbf16, #tpu.memory_space<vmem>>, vector<128x256xbf16>
    %cst_8 = arith.constant dense<0.000000e+00> : vector<104x256xf32>
    %11 = tpu.matmul %9, %10, %cst_8 {dimension_numbers = #tpu.dot_dimension_numbers<[1], [0], [0], [1], [0, 0, 1, 1], [], []>} : vector<104x128xbf16>, vector<128x256xbf16>, vector<104x256xf32> -> vector<104x256xf32>
    %c0_9 = arith.constant 0 : index
    %c0_10 = arith.constant 0 : index
    %12 = vector.load %arg5[%c0_9, %c0_10] : memref<1x256xf32, #tpu.memory_space<vmem>>, vector<1x256xf32>
    %13 = vector.broadcast %12 : vector<1x256xf32> to vector<104x256xf32>
    %14 = arith.addf %11, %13 : vector<104x256xf32>
    %cst_11 = arith.constant 0.000000e+00 : f32
    %15 = vector.broadcast %cst_11 : f32 to vector<104x256xf32>
    %16 = arith.maximumf %14, %15 : vector<104x256xf32>
    %17 = arith.truncf %16 : vector<104x256xf32> to vector<104x256xbf16>
    %c0_12 = arith.constant 0 : index
    %c0_13 = arith.constant 0 : index
    %18 = vector.load %arg6[%c0_12, %c0_13] : memref<256x10xbf16, #tpu.memory_space<vmem>>, vector<256x10xbf16>
    %cst_14 = arith.constant dense<0.000000e+00> : vector<104x10xf32>
    %19 = tpu.matmul %17, %18, %cst_14 {dimension_numbers = #tpu.dot_dimension_numbers<[1], [0], [0], [1], [0, 0, 1, 1], [], []>} : vector<104x256xbf16>, vector<256x10xbf16>, vector<104x10xf32> -> vector<104x10xf32>
    %c0_15 = arith.constant 0 : index
    %c0_16 = arith.constant 0 : index
    %20 = vector.load %arg7[%c0_15, %c0_16] : memref<1x10xf32, #tpu.memory_space<vmem>>, vector<1x10xf32>
    %21 = vector.broadcast %20 : vector<1x10xf32> to vector<104x10xf32>
    %22 = arith.addf %19, %21 : vector<104x10xf32>
    %c0_17 = arith.constant 0 : index
    %c0_18 = arith.constant 0 : index
    %23 = vector.load %arg8[%c0_17, %c0_18] : memref<104x10xf32, #tpu.memory_space<vmem>>, vector<104x10xf32>
    tpu.vector_store %arg8[%c0_17, %c0_18], %22 {strides = array<i32>} : memref<104x10xf32, #tpu.memory_space<vmem>>, vector<104x10xf32>,
    return
  }
  func.func @transform_0(%arg0: i32) -> (i32, i32) {
    %c0_i32 = arith.constant 0 : i32
    %c0_i32_0 = arith.constant 0 : i32
    return %arg0, %c0_i32 : i32, i32
  }
  func.func @transform_1(%arg0: i32) -> (i32, i32) {
    %c0_i32 = arith.constant 0 : i32
    %c0_i32_0 = arith.constant 0 : i32
    %c0_i32_1 = arith.constant 0 : i32
    return %c0_i32, %c0_i32_0 : i32, i32
  }
  func.func @transform_2(%arg0: i32) -> (i32, i32) {
    %c0_i32 = arith.constant 0 : i32
    %c0_i32_0 = arith.constant 0 : i32
    %c0_i32_1 = arith.constant 0 : i32
    return %c0_i32, %c0_i32_0 : i32, i32
  }
  func.func @transform_3(%arg0: i32) -> (i32, i32) {
    %c0_i32 = arith.constant 0 : i32
    %c0_i32_0 = arith.constant 0 : i32
    %c0_i32_1 = arith.constant 0 : i32
    return %c0_i32, %c0_i32_0 : i32, i32
  }
  func.func @transform_4(%arg0: i32) -> (i32, i32) {
    %c0_i32 = arith.constant 0 : i32
    %c0_i32_0 = arith.constant 0 : i32
    %c0_i32_1 = arith.constant 0 : i32
    return %c0_i32, %c0_i32_0 : i32, i32
  }
  func.func @transform_5(%arg0: i32) -> (i32, i32) {
    %c0_i32 = arith.constant 0 : i32
    %c0_i32_0 = arith.constant 0 : i32
    %c0_i32_1 = arith.constant 0 : i32
    return %c0_i32, %c0_i32_0 : i32, i32
  }
  func.func @transform_6(%arg0: i32) -> (i32, i32) {
    %c0_i32 = arith.constant 0 : i32
    %c0_i32_0 = arith.constant 0 : i32
    %c0_i32_1 = arith.constant 0 : i32
    return %c0_i32, %c0_i32_0 : i32, i32
  }
  func.func @transform_7(%arg0: i32) -> (i32, i32) {
    %c0_i32 = arith.constant 0 : i32
    %c0_i32_0 = arith.constant 0 : i32
    return %arg0, %c0_i32 : i32, i32
  }
}

</mosaic_0001>

<bundles_post_ra>
// kernel: mnist_nn_forward.1
= control target key start
LH: loop header
LB: loop body
LE: loop exit
PB: predicated region body
PF: predicated region fallthrough
CT: control target
= control target key end

     0   :  { %s2689_s24 = smov 0   ;;  %s2691_s25 = smov 0   ;;  %s3317_s0 = inlined_call_operand.vmem [shape: f32[200,784], index: 0, kind: input, shape index: {}]   ;;  %s3318_s1 = inlined_call_operand.vmem [shape: bf16[784,128], index: 1, kind: input, shape index: {}]   ;;  %s3319_s2 = inlined_call_operand.vmem [shape: f32[1,128], index: 2, kind: input, shape index: {}]   ;;  %s3320_s3 = inlined_call_operand.vmem [shape: bf16[128,256], index: 3, kind: input, shape index: {}]   ;;  %s3321_s4 = inlined_call_operand.vmem [shape: f32[1,256], index: 4, kind: input, shape index: {}]   ;;  %s3322_s5 = inlined_call_operand.vmem [shape: bf16[256,10], index: 5, kind: input, shape index: {}]   ;;  %s3323_s6 = inlined_call_operand.vmem [shape: f32[1,10], index: 6, kind: input, shape index: {}]   ;;  %s3324_s7 = inlined_call_operand.vmem [shape: f32[200,10], index: 7, kind: output, shape index: {}]  }
   0x1   :  { %s2693_s26 = smov 0  }
   0x2 LB: > { %s2702_s27 = sadd.s32 4294967295, %s2612_s26   ;;  %s2704_s28 = sadd.s32 1, %s2612_s26   ;;  %s2612_s26 = sphi %s2693_s26, %s3331_s26   ;;  %s2608_s25 = sphi %s2691_s25, %s3330_s25   ;;  %s2604_s24 = sphi %s2689_s24, %s3329_s24  }
   0x3   : > { %s173_s29 = ssub.s32 %s2612_s26, %s2704_s28  ;;  %s176_s30 = sadd.s32 1, %s2608_s25 }
   0x4   : > { %p174_p0 = scmp.eq.s32.totalorder %s173_s29, 0  ;;  %p186_p1 = scmp.ne.s32.totalorder %s2608_s25, %s2604_s24 }
   0x5   : > { %p187_p2 = scmp.eq.s32.totalorder %s2702_s27, 1  ;;  %p1996_p3 = scmp.ge.s32.totalorder %s2612_s26, 1 }
   0x6   : > { %s2712_s8 = scalar_select %p174_p0, %s2608_s25, %s176_s30  }
   0x7   : > { %p2714_p4 = por %p187_p2, %p186_p1  ;;  %p249_p5 = scmp.lt.s32.totalorder %s2612_s26, 3 }
   0x9   : > { %p250_p6 = pnand %p1996_p3, %p249_p5 }
   0xa   : > { %v2465_v0 = vld [vmem:[%s3318_s1 + $0x40] sm:$0xff] (!%p250_p6)   ;;  %v2469_v4 = vld [vmem:[%s3318_s1 + $0x48] sm:$0xff] (!%p250_p6)   ;;  %v2473_v8 = vld [vmem:[%s3318_s1 + $0x50] sm:$0xff] (!%p250_p6)   ;;  %s2758_s19 = smul.u32 (!%p250_p6), 13, %s2702_s27  ;;  %v2646_v43 = vmov (!%p250_p6), 0.0   ;;  %vm848_vm0 = vcmask (!%p250_p6), 130048  }
   0xb   : > { %253 = sbr.rel (%p250_p6) target bundleno = 873 (0x369), region = 48  ;;  %v2466_v1 = vld [vmem:[%s3318_s1] sm:$0xff] (!%p250_p6)   ;;  %2101 = vmatprep.subr.bf16.mxu0 (!%p250_p6), %v2465_v0  ;;  %v2470_v5 = vld [vmem:[%s3318_s1 + $0x8] sm:$0xff] (!%p250_p6)   ;;  %v2474_v9 = vld [vmem:[%s3318_s1 + $0x10] sm:$0xff] (!%p250_p6)   ;;  %vm2647_vm1 = vmmov (!%p250_p6), 0   ;;  %s283_s23 = sand.u32 (!%p250_p6), 1, %s2604_s24  }
   0xc   : > { %v2467_v2 = vld [vmem:[%s3318_s1 + $0xc0] sm:$0xff] (!%p250_p6)   ;;  %2102 = vmatpush3.bf16.msra.mxu0 (!%p250_p6), %v2466_v1  ;;  %v2471_v6 = vld [vmem:[%s3318_s1 + $0xc8] sm:$0xff] (!%p250_p6)   ;;  %v2475_v10 = vld [vmem:[%s3318_s1 + $0xd0] sm:$0xff] (!%p250_p6)   ;;  %p292_p7 = scmp.lt.s32.totalorder (!%p250_p6), %s2758_s19, 24  ;;  %s2371_s29 = smul.u32 (!%p250_p6), 104, %s283_s23  ;;  %vm1714_vm2 = vcmask (!%p250_p6), 80896  }
   0xd   : > { %v2468_v3 = vld [vmem:[%s3318_s1 + $0x80] sm:$0xff] (!%p250_p6)   ;;  %2159 = vmatprep.subr.bf16.mxu1 (!%p250_p6), %v2467_v2  ;;  %2103 = vmatprep.subr.bf16.mxu0 (!%p250_p6), %v2469_v4  ;;  %v2472_v7 = vld [vmem:[%s3318_s1 + $0x88] sm:$0xff] (!%p250_p6)   ;;  %v2476_v11 = vld [vmem:[%s3318_s1 + $0x90] sm:$0xff] (!%p250_p6)  }
   0xe   : > { %2160 = vmatpush3.bf16.msra.mxu1 (!%p250_p6), %v2468_v3  ;;  %v2477_v12 = vld [vmem:[%s3318_s1 + $0x58] sm:$0xff] (!%p250_p6)   ;;  %v2481_v16 = vld [vmem:[%s3318_s1 + $0x60] sm:$0xff] (!%p250_p6)   ;;  %v2485_v20 = vld [vmem:[%s3318_s1 + $0x68] sm:$0xff] (!%p250_p6)   ;;  %s3188_s10 = scalar_lea.vmem (!%p250_p6), [#allocation2], %s2371_s29  }
   0xf   : > { %2161 = vmatprep.subr.bf16.mxu1 (!%p250_p6), %v2471_v6  ;;  %v2478_v13 = vld [vmem:[%s3318_s1 + $0x18] sm:$0xff] (!%p250_p6)   ;;  %v2482_v17 = vld [vmem:[%s3318_s1 + $0x20] sm:$0xff] (!%p250_p6)   ;;  %v2486_v21 = vld [vmem:[%s3318_s1 + $0x28] sm:$0xff] (!%p250_p6)  }
  0x10   : > { %2104 = vmatpush3.bf16.msra.mxu0 (!%p250_p6), %v2470_v5  ;;  %v2479_v14 = vld [vmem:[%s3318_s1 + $0xd8] sm:$0xff] (!%p250_p6)   ;;  %v2483_v18 = vld [vmem:[%s3318_s1 + $0xe0] sm:$0xff] (!%p250_p6)   ;;  %v2487_v22 = vld [vmem:[%s3318_s1 + $0xe8] sm:$0xff] (!%p250_p6)  }
  0x11   : > { %2105 = vmatprep.subr.bf16.mxu0 (!%p250_p6), %v2473_v8  ;;  %v2480_v15 = vld [vmem:[%s3318_s1 + $0x98] sm:$0xff] (!%p250_p6)   ;;  %v2484_v19 = vld [vmem:[%s3318_s1 + $0xa0] sm:$0xff] (!%p250_p6)   ;;  %v2488_v23 = vld [vmem:[%s3318_s1 + $0xa8] sm:$0xff] (!%p250_p6)  }
  0x12   : > { %2162 = vmatpush3.bf16.msra.mxu1 %v2472_v7  ;;  %s293_s20 = scalar_select %p292_p7, %s2758_s19, 24  ;;  %v2489_v24 = vld [vmem:[%s3318_s1 + $0x70] sm:$0xff]   ;;  %v2493_v28 = vld [vmem:[%s3318_s1 + $0x78] sm:$0xff]   ;;  %v2497_v38 = vld [vmem:[%s3318_s1 + $0x140] sm:$0xff]  }
  0x13   : > { %2163 = vmatprep.subr.bf16.mxu1 %v2475_v10  ;;  %v2490_v25 = vld [vmem:[%s3318_s1 + $0x30] sm:$0xff]   ;;  %v2494_v29 = vld [vmem:[%s3318_s1 + $0x38] sm:$0xff]   ;;  %v2498_v42 = vld [vmem:[%s3318_s1 + $0x100] sm:$0xff]   ;;  %s1736_s24 = ssub.s32 (%p2714_p4), 25, %s2758_s19  ;;  %s2100_s11 = smul.u32 (%p2714_p4), 104, %s2702_s27 }
  0x14   : > { %2106 = vmatpush3.bf16.msra.mxu0 %v2474_v9  ;;  %s2372_s12 = smul.u32 56, %s293_s20  ;;  %v2491_v26 = vld [vmem:[%s3318_s1 + $0xf0] sm:$0xff]   ;;  %v2495_v30 = vld [vmem:[%s3318_s1 + $0xf8] sm:$0xff]   ;;  %v2499_v47 = vld [vmem:[%s3318_s1 + $0x180] sm:$0xff]   ;;  %p1737_p8 = scmp.lt.s32.totalorder (%p2714_p4), %s1736_s24, 13 }
  0x15   : > { %2107 = vmatprep.subr.bf16.mxu0 %v2477_v12  ;;  %v2492_v27 = vld [vmem:[%s3318_s1 + $0xb0] sm:$0xff]   ;;  %v2496_v34 = vld [vmem:[%s3318_s1 + $0xb8] sm:$0xff]   ;;  %v2500_v51 = vld [vmem:[%s3318_s1 + $0x148] sm:$0xff]   ;;  %s3235_s14 = scalar_lea.vmem (%p2714_p4), %s3324_s7, %s2100_s11  }
  0x16   : > { %2164 = vmatpush3.bf16.msra.mxu1 %v2476_v11  ;;  %s2813_s26 = scalar_lea.vmem %s3317_s0, %s2372_s12  ;;  %v2501_v55 = vld [vmem:[%s3318_s1 + $0x108] sm:$0xff]   ;;  %v2502_v62 = vld [vmem:[%s3318_s1 + $0x150] sm:$0xff]   ;;  %v2504_v10 = vld [vmem:[%s3318_s1 + $0x158] sm:$0xff]  }
  0x17   : > { %2165 = vmatprep.subr.bf16.mxu1 %v2479_v14  ;;  %v310_v31 = vld [vmem:[%s2813_s26 + $0x8] sm:$0xff]  ;;  %v317_v32 = vld [vmem:[%s2813_s26 + $0x40] sm:$0xff]  ;;  %v316_v36 = vld [vmem:[%s2813_s26 + $0x38] sm:$0xff] }
  0x18   : > { %2108 = vmatpush3.bf16.msra.mxu0 %v2478_v13  ;;  %v401_v33 = vpack.c.bf16 %v317_v32, %v310_v31  ;;  %v309_v35 = vld [vmem:[%s2813_s26] sm:$0xff]  ;;  %v312_v39 = vld [vmem:[%s2813_s26 + $0x18] sm:$0xff]  ;;  %v319_v40 = vld [vmem:[%s2813_s26 + $0x50] sm:$0xff] }
  0x19   : > { %2109 = vmatprep.subr.bf16.mxu0 %v2481_v16  ;;  %v400_v37 = vpack.c.bf16 %v316_v36, %v309_v35  ;;  %v403_v41 = vpack.c.bf16 %v319_v40, %v312_v39  ;;  %v311_v44 = vld [vmem:[%s2813_s26 + $0x10] sm:$0xff]  ;;  %v318_v45 = vld [vmem:[%s2813_s26 + $0x48] sm:$0xff]  ;;  %v324_v48 = vld [vmem:[%s2813_s26 + $0x78] sm:$0xff] }
  0x1a   : > { %2166 = vmatpush3.bf16.msra.mxu1 %v2480_v15  ;;  %902 = vmatprep.mubr.bf16.mxu0 %v401_v33  ;;  %v402_v46 = vpack.c.bf16 %v318_v45, %v311_v44  ;;  %v331_v49 = vld [vmem:[%s2813_s26 + $0xb0] sm:$0xff]  ;;  %v330_v53 = vld [vmem:[%s2813_s26 + $0xa8] sm:$0xff]  ;;  %v333_v57 = vld [vmem:[%s2813_s26 + $0xc0] sm:$0xff] }
  0x1b   : > { %2167 = vmatprep.subr.bf16.mxu1 %v2483_v18  ;;  %990 = vmatprep.mubr.bf16.mxu1 %v403_v41  ;;  %v408_v50 = vpack.c.bf16 %v331_v49, %v324_v48  ;;  %v323_v52 = vld [vmem:[%s2813_s26 + $0x70] sm:$0xff]  ;;  %v326_v56 = vld [vmem:[%s2813_s26 + $0x88] sm:$0xff]  ;;  %v325_v58 = vld [vmem:[%s2813_s26 + $0x80] sm:$0xff] }
  0x1c   : > { %2110 = vmatpush3.bf16.msra.mxu0 %v2482_v17  ;;  %v407_v54 = vpack.c.bf16 %v330_v53, %v323_v52  ;;  %v410_v59 = vpack.c.bf16 %v333_v57, %v326_v56  ;;  %v332_v60 = vld [vmem:[%s2813_s26 + $0xb8] sm:$0xff]  ;;  %v338_v63 = vld [vmem:[%s2813_s26 + $0xe8] sm:$0xff]  ;;  %v345_v0 = vld [vmem:[%s2813_s26 + $0x120] sm:$0xff] }
  0x1d   : > { %2111 = vmatprep.subr.bf16.mxu0 %v2485_v20  ;;  %v409_v61 = vpack.c.bf16 %v332_v60, %v325_v58  ;;  %v415_v1 = vpack.c.bf16 %v345_v0, %v338_v63  ;;  %v2503_v2 = vld [vmem:[%s3318_s1 + $0x110] sm:$0xff]   ;;  %v337_v3 = vld [vmem:[%s2813_s26 + $0xe0] sm:$0xff]  ;;  %v344_v4 = vld [vmem:[%s2813_s26 + $0x118] sm:$0xff] }
  0x1e   : > { %2168 = vmatpush3.bf16.msra.mxu1 %v2484_v19  ;;  %v340_v5 = vld [vmem:[%s2813_s26 + $0xf8] sm:$0xff]  ;;  %v347_v6 = vld [vmem:[%s2813_s26 + $0x130] sm:$0xff]  ;;  %v346_v8 = vld [vmem:[%s2813_s26 + $0x128] sm:$0xff]  ;;  %v414_v11 = vpack.c.bf16 %v344_v4, %v337_v3 }
  0x1f   : > { %2169 = vmatprep.subr.bf16.mxu1 %v2487_v22  ;;  %v339_v7 = vld [vmem:[%s2813_s26 + $0xf0] sm:$0xff]  ;;  %v417_v9 = vpack.c.bf16 %v347_v6, %v340_v5  ;;  %v2505_v12 = vld [vmem:[%s3318_s1 + $0x118] sm:$0xff]   ;;  %v354_v16 = vld [vmem:[%s2813_s26 + $0x168] sm:$0xff] }
  0x20   : > { %2112 = vmatpush3.bf16.msra.mxu0 %v2486_v21  ;;  %v352_v13 = vld [vmem:[%s2813_s26 + $0x158] sm:$0xff]  ;;  %v359_v14 = vld [vmem:[%s2813_s26 + $0x190] sm:$0xff]  ;;  %v361_v17 = vld [vmem:[%s2813_s26 + $0x1a0] sm:$0xff]  ;;  %v416_v18 = vpack.c.bf16 %v346_v8, %v339_v7 }
  0x21   : > { %2113 = vmatprep.subr.bf16.mxu0 %v2489_v24  ;;  %v422_v15 = vpack.c.bf16 %v359_v14, %v352_v13  ;;  %v351_v19 = vld [vmem:[%s2813_s26 + $0x150] sm:$0xff]  ;;  %v424_v20 = vpack.c.bf16 %v361_v17, %v354_v16  ;;  %v2506_v21 = vld [vmem:[%s3318_s1 + $0x160] sm:$0xff]   ;;  %v358_v22 = vld [vmem:[%s2813_s26 + $0x188] sm:$0xff] }
  0x22   : > { %2170 = vmatpush3.bf16.msra.mxu1 %v2488_v23  ;;  %v2507_v23 = vld [vmem:[%s3318_s1 + $0x120] sm:$0xff]   ;;  %v366_v24 = vld [vmem:[%s2813_s26 + $0x1c8] sm:$0xff]  ;;  %v372_v36 = vld [vmem:[%s2813_s26 + $0x1f8] sm:$0xff] }
  0x23   : > { %2171 = vmatprep.subr.bf16.mxu1 %v2491_v26  ;;  %v353_v26 = vld [vmem:[%s2813_s26 + $0x160] sm:$0xff]  ;;  %v2508_v32 = vld [vmem:[%s3318_s1 + $0x168] sm:$0xff]   ;;  %v387_v39 = vld [vmem:[%s2813_s26 + $0x270] sm:$0xff] }
  0x24   : > { %2114 = vmatpush3.bf16.msra.mxu0 %v2490_v25  ;;  %v373_v25 = vld [vmem:[%s2813_s26 + $0x200] sm:$0xff]  ;;  %v2509_v33 = vld [vmem:[%s3318_s1 + $0x128] sm:$0xff]   ;;  %v2510_v40 = vld [vmem:[%s3318_s1 + $0x170] sm:$0xff]  }
  0x25   : > { %2115 = vmatprep.subr.bf16.mxu0 %v2493_v28  ;;  %v368_v28 = vld [vmem:[%s2813_s26 + $0x1d8] sm:$0xff]  ;;  %v429_v31 = vpack.c.bf16 %v373_v25, %v366_v24  ;;  %v365_v35 = vld [vmem:[%s2813_s26 + $0x1c0] sm:$0xff]  ;;  %v2511_v41 = vld [vmem:[%s3318_s1 + $0x130] sm:$0xff]  }
  0x26   : > { %2172 = vmatpush3.bf16.msra.mxu1 %v2492_v27  ;;  %v360_v27 = vld [vmem:[%s2813_s26 + $0x198] sm:$0xff]  ;;  %v374_v44 = vld [vmem:[%s2813_s26 + $0x208] sm:$0xff]  ;;  %v389_v49 = vld [vmem:[%s2813_s26 + $0x280] sm:$0xff] }
  0x27   : > { %2173 = vmatprep.subr.bf16.mxu1 %v2495_v30  ;;  %v375_v30 = vld [vmem:[%s2813_s26 + $0x210] sm:$0xff]  ;;  %v382_v45 = vld [vmem:[%s2813_s26 + $0x248] sm:$0xff]  ;;  %v381_v57 = vld [vmem:[%s2813_s26 + $0x240] sm:$0xff] }
  0x28   : > { %2116 = vmatpush3.bf16.msra.mxu0 %v2494_v29  ;;  %v421_v29 = vpack.c.bf16 %v358_v22, %v351_v19  ;;  %v438_v52 = vpack.c.bf16 %v389_v49, %v382_v45  ;;  %v379_v53 = vld [vmem:[%s2813_s26 + $0x230] sm:$0xff]  ;;  %v388_v58 = vld [vmem:[%s2813_s26 + $0x278] sm:$0xff]  ;;  %v393_v63 = vld [vmem:[%s2813_s26 + $0x2a0] sm:$0xff] }
  0x29   : > { %2217 = vmatprep.subr.bf16.mxu0 %v2497_v38  ;;  %v380_v38 = vld [vmem:[%s2813_s26 + $0x238] sm:$0xff]  ;;  %v314_v0 = vld [vmem:[%s2813_s26 + $0x28] sm:$0xff]  ;;  %v442_v3 = vpack.c.bf16 %v393_v63, %v393_v63  ;;  %v313_v6 = vld [vmem:[%s2813_s26 + $0x20] sm:$0xff] }
  0x2a   : > { %2174 = vmatpush3.bf16.msra.mxu1 %v2496_v34  ;;  %v423_v34 = vpack.c.bf16 %v360_v27, %v353_v26  ;;  %v436_v48 = vpack.c.bf16 %v387_v39, %v380_v38  ;;  %v396_v60 = vld [vmem:[%s2813_s26 + $0x2b8] sm:$0xff]  ;;  %v334_v16 = vld [vmem:[%s2813_s26 + $0xc8] sm:$0xff]  ;;  %v341_v24 = vld [vmem:[%s2813_s26 + $0x100] sm:$0xff] }
  0x2b   : > { %2341 = vmatprep.subr.bf16.mxu1 %v2646_v43  ;;  %903 = vmatmul.mubr.bf16.vlgmr.msra.gmra.mrb[0].mxu0 %v400_v37  ;;  %v431_v37 = vpack.c.bf16 %v375_v30, %v368_v28  ;;  %v320_v7 = vld [vmem:[%s2813_s26 + $0x58] sm:$0xff]  ;;  %v342_v17 = vld [vmem:[%s2813_s26 + $0x108] sm:$0xff]  ;;  %v363_v27 = vld [vmem:[%s2813_s26 + $0x1b0] sm:$0xff] }
  0x2c   : > { %2218 = vmatpush3.bf16.msra.mxu0 %v2498_v42  ;;  %910 = vmatprep.mubr.bf16.mxu0 %v408_v50  ;;  %v367_v42 = vld [vmem:[%s2813_s26 + $0x1d0] sm:$0xff]  ;;  %v2513_v50 = vld [vmem:[%s3318_s1 + $0x138] sm:$0xff]   ;;  %v350_v30 = vld [vmem:[%s2813_s26 + $0x148] sm:$0xff] }
  0x2d   : > { %991 = vmatmul.mubr.bf16.vlgmr.msra.gmra.mrb[0].mxu1 %v402_v46  ;;  %2219 = vmatprep.subr.bf16.mxu0 %v2500_v51  ;;  %v428_v46 = vpack.c.bf16 %v372_v36, %v365_v35  ;;  %v430_v51 = vpack.c.bf16 %v374_v44, %v367_v42  ;;  %v328_v8 = vld [vmem:[%s2813_s26 + $0x98] sm:$0xff]  ;;  %v370_v35 = vld [vmem:[%s2813_s26 + $0x1e8] sm:$0xff]  ;;  %v377_v36 = vld [vmem:[%s2813_s26 + $0x220] sm:$0xff] }
  0x2e   : > { %2342 = vmatpush3.bf16.msra.mxu1 %v2499_v47  ;;  %998 = vmatprep.mubr.bf16.mxu1 %v410_v59  ;;  %v2512_v47 = vld [vmem:[%s3318_s1 + $0x178] sm:$0xff]   ;;  %v357_v38 = vld [vmem:[%s2813_s26 + $0x180] sm:$0xff]  ;;  %v378_v49 = vld [vmem:[%s2813_s26 + $0x228] sm:$0xff] }
  0x2f   : > { %v348_v25 = vld [vmem:[%s2813_s26 + $0x138] sm:$0xff]  ;;  %v369_v42 = vld [vmem:[%s2813_s26 + $0x1e0] sm:$0xff] }
  0x30   : > { %2220 = vmatpush3.bf16.msra.mxu0 %v2501_v55  ;;  %v394_v55 = vld [vmem:[%s2813_s26 + $0x2a8] sm:$0xff]  ;;  %v356_v26 = vld [vmem:[%s2813_s26 + $0x178] sm:$0xff]  ;;  %v418_v28 = vpack.c.bf16 %v348_v25, %v341_v24  ;;  %v3061_v24 = vld [vmem:[%s3319_s2] ss:$0 sm:$0xff] }
  0x31   : > { %2221 = vmatprep.subr.bf16.mxu0 %v2502_v62  ;;  %v443_v59 = vpack.c.bf16 %v394_v55, %v394_v55  ;;  %v445_v62 = vpack.c.bf16 %v396_v60, %v396_v60  ;;  %v364_v39 = vld [vmem:[%s2813_s26 + $0x1b8] sm:$0xff]  ;;  %v397_v60 = vld [vmem:[%s2813_s26 + $0x2c0] sm:$0xff] }
  0x32   : > { %v376_v44 = vld [vmem:[%s2813_s26 + $0x218] sm:$0xff]  ;;  %v2514_v63 = vld [vmem:[%s3320_s3] ss:$8 sps:$4 sm:$0xff]  }
  0x33   : > { %911 = vmatmul.mubr.bf16.gmra.mrb[4].mxu0 %v407_v54  ;;  %v386_v54 = vld [vmem:[%s2813_s26 + $0x268] sm:$0xff]  ;;  %v384_v45 = vld [vmem:[%s2813_s26 + $0x258] sm:$0xff] }
  0x34   : > { %918 = vmatprep.mubr.bf16.mxu0 %v415_v1  ;;  %2222 = vmatpush3.bf16.msra.mxu0 %v2503_v2  ;;  %v435_v56 = vpack.c.bf16 %v386_v54, %v379_v53  ;;  %v321_v1 = vld [vmem:[%s2813_s26 + $0x60] sm:$0xff]  ;;  %v395_v2 = vld [vmem:[%s2813_s26 + $0x2b0] sm:$0xff]  ;;  %v390_v53 = vld [vmem:[%s2813_s26 + $0x288] sm:$0xff] }
  0x35   : > { %999 = vmatmul.mubr.bf16.gmra.mrb[4].mxu1 %v409_v61  ;;  %2223 = vmatprep.subr.bf16.mxu0 %v2504_v10  ;;  %v437_v61 = vpack.c.bf16 %v388_v58, %v381_v57  ;;  %v405_v4 = vpack.c.bf16 %v321_v1, %v314_v0  ;;  %v444_v5 = vpack.c.bf16 %v395_v2, %v395_v2  ;;  %v315_v10 = vld [vmem:[%s2813_s26 + $0x30] sm:$0xff]  ;;  %v398_v54 = vld [vmem:[%s2813_s26 + $0x2c8] sm:$0xff]  ;;  %v392_v57 = vld [vmem:[%s2813_s26 + $0x298] sm:$0xff] }
  0x36   : > { %1006 = vmatprep.mubr.bf16.mxu1 %v417_v9  ;;  %v335_v9 = vld [vmem:[%s2813_s26 + $0xd0] sm:$0xff]  ;;  %v447_v58 = vpack.c.bf16 %v398_v54, %v398_v54  ;;  %v2516_v0 = vld [vmem:[%s3320_s3 + $0x4] ss:$8 sps:$4 sm:$0xff]  }
  0x37   : > { %v412_v13 = vpack.c.bf16 %v335_v9, %v328_v8  ;;  %v2517_v2 = vld [vmem:[%s3320_s3 + $0x10] ss:$8 sps:$4 sm:$0xff]   ;;  %v2528_v8 = vld [vmem:[%s3320_s3 + $0x44] ss:$8 sps:$4 sm:$0xff]  }
  0x38   : > { %2224 = vmatpush3.bf16.msra.mxu0 %v2505_v12  ;;  %v404_v12 = vpack.c.bf16 %v320_v7, %v313_v6  ;;  %v2525_v6 = vld [vmem:[%s3320_s3 + $0x34] ss:$8 sps:$4 sm:$0xff]   ;;  %v2526_v7 = vld [vmem:[%s3320_s3 + $0x40] ss:$8 sps:$4 sm:$0xff]   ;;  %v2529_v9 = vld [vmem:[%s3320_s3 + $0x50] ss:$8 sps:$4 sm:$0xff]  }
  0x39   : > { %2225 = vmatprep.subr.bf16.mxu0 %v2506_v21  ;;  %v336_v21 = vld [vmem:[%s2813_s26 + $0xd8] sm:$0xff] }
  0x3b   : > { %919 = vmatmul.mubr.bf16.gmra.mrb[8].mxu0 %v414_v11  ;;  %v322_v11 = vld [vmem:[%s2813_s26 + $0x68] sm:$0xff] }
  0x3c   : > { %926 = vmatprep.mubr.bf16.mxu0 %v422_v15  ;;  %2226 = vmatpush3.bf16.msra.mxu0 %v2507_v23  ;;  %v406_v14 = vpack.c.bf16 %v322_v11, %v315_v10  ;;  %v327_v15 = vld [vmem:[%s2813_s26 + $0x90] sm:$0xff]  ;;  %v2532_v11 = vld [vmem:[%s3320_s3 + $0x60] ss:$8 sps:$4 sm:$0xff]  }
  0x3d   : > { %1007 = vmatmul.mubr.bf16.gmra.mrb[8].mxu1 %v416_v18  ;;  %2227 = vmatprep.subr.bf16.mxu0 %v2508_v32  ;;  %v349_v18 = vld [vmem:[%s2813_s26 + $0x140] sm:$0xff]  ;;  %v411_v19 = vpack.c.bf16 %v334_v16, %v327_v15  ;;  %v2531_v10 = vld [vmem:[%s3320_s3 + $0x54] ss:$8 sps:$4 sm:$0xff]   ;;  %v2648_v15 = vmov 0  }
  0x3e   : > { %1014 = vmatprep.mubr.bf16.mxu1 %v424_v20  ;;  %v329_v20 = vld [vmem:[%s2813_s26 + $0xa0] sm:$0xff]  ;;  %v419_v22 = vpack.c.bf16 %v349_v18, %v342_v17  ;;  %v2540_v18 = vld [vmem:[%s3322_s5 + $0x48] sm:$0xff]  }
  0x3f   : > { %v413_v23 = vpack.c.bf16 %v336_v21, %v329_v20  ;;  %v2538_v16 = vld [vmem:[%s3322_s5 + $0x40] sm:$0xff]   ;;  %v2542_v20 = vld [vmem:[%s3322_s5 + $0x50] sm:$0xff]  }
  0x40   : > { %2228 = vmatpush3.bf16.msra.mxu0 %v2509_v33  ;;  %v355_v33 = vld [vmem:[%s2813_s26 + $0x170] sm:$0xff]  ;;  %v2539_v17 = vld [vmem:[%s3322_s5] sm:$0xff]   ;;  %2283 = vmatprep.subr.bf16.mxu1 %v2538_v16 }
  0x41   : > { %2229 = vmatprep.subr.bf16.mxu0 %v2510_v40  ;;  %v433_v40 = vpack.c.bf16 %v377_v36, %v370_v35  ;;  %v2543_v21 = vld [vmem:[%s3322_s5 + $0x10] sm:$0xff]  }
  0x43   : > { %927 = vmatmul.mubr.bf16.gmra.mrb[12].mxu0 %v421_v29  ;;  %v343_v29 = vld [vmem:[%s2813_s26 + $0x110] sm:$0xff] }
  0x44   : > { %934 = vmatprep.mubr.bf16.mxu0 %v429_v31  ;;  %2230 = vmatpush3.bf16.msra.mxu0 %v2511_v41  ;;  %v426_v31 = vpack.c.bf16 %v363_v27, %v356_v26  ;;  %v420_v32 = vpack.c.bf16 %v350_v30, %v343_v29  ;;  %v427_v41 = vpack.c.bf16 %v364_v39, %v357_v38  ;;  %v2545_v26 = vld [vmem:[%s3322_s5 + $0x18] sm:$0xff]   ;;  %v2546_v29 = vld [vmem:[%s3322_s5 + $0x60] sm:$0xff]  }
  0x45   : > { %1015 = vmatmul.mubr.bf16.gmra.mrb[12].mxu1 %v423_v34  ;;  %2231 = vmatprep.subr.bf16.mxu0 %v2512_v47  ;;  %v362_v34 = vld [vmem:[%s2813_s26 + $0x1a8] sm:$0xff]  ;;  %v432_v47 = vpack.c.bf16 %v376_v44, %v369_v42 }
  0x46   : > { %1022 = vmatprep.mubr.bf16.mxu1 %v431_v37  ;;  %v425_v37 = vpack.c.bf16 %v362_v34, %v355_v33 }
  0x48   : > { %2232 = vmatpush3.bf16.msra.mxu0 %v2513_v50 }
  0x49   : > { %1350 = vmatprep.subr.bf16.mxu0 %v2516_v0 }
  0x4b   : > { %935 = vmatmul.mubr.bf16.gmra.mrb[16].mxu0 %v428_v46  ;;  %v391_v46 = vld [vmem:[%s2813_s26 + $0x290] sm:$0xff] }
  0x4c   : > { %942 = vmatprep.mubr.bf16.mxu0 %v436_v48  ;;  %v371_v48 = vld [vmem:[%s2813_s26 + $0x1f0] sm:$0xff]  ;;  %v440_v50 = vpack.c.bf16 %v391_v46, %v384_v45 }
  0x4d   : > { %1023 = vmatmul.mubr.bf16.gmra.mrb[16].mxu1 %v430_v51  ;;  %v434_v51 = vpack.c.bf16 %v378_v49, %v371_v48 }
  0x4e   : > { %1030 = vmatprep.mubr.bf16.mxu1 %v438_v52  ;;  %v383_v52 = vld [vmem:[%s2813_s26 + $0x250] sm:$0xff] }
  0x4f   : > { %v439_v55 = vpack.c.bf16 %v390_v53, %v383_v52 }
  0x53   : > { %943 = vmatmul.mubr.bf16.gmra.mrb[20].mxu0 %v435_v56  ;;  %v385_v56 = vld [vmem:[%s2813_s26 + $0x260] sm:$0xff] }
  0x54   : > { %950 = vmatprep.mubr.bf16.mxu0 %v443_v59  ;;  %v441_v59 = vpack.c.bf16 %v392_v57, %v385_v56 }
  0x55   : > { %1031 = vmatmul.mubr.bf16.gmra.mrb[20].mxu1 %v437_v61  ;;  %v446_v61 = vpack.c.bf16 %v397_v60, %v397_v60 }
  0x56   : > { %1038 = vmatprep.mubr.bf16.mxu1 %v445_v62  ;;  %v399_v62 = vld [vmem:[%s2813_s26 + $0x2d0] sm:$0xff] }
  0x57   : > { %v448_v1 = vpack.c.bf16 %v399_v62, %v399_v62 }
  0x5b   : > { %951 = vmatmul.mubr.bf16.gmra.mrb[24].mxu0 %v442_v3  ;;  %v2520_v3 = vld [vmem:[%s3320_s3 + $0x20] ss:$8 sps:$4 sm:$0xff]  }
  0x5c   : > { %1078 = vmatprep.mubr.bf16.mxu0 %v405_v4  ;;  %v2522_v4 = vld [vmem:[%s3320_s3 + $0x24] ss:$8 sps:$4 sm:$0xff]  }
  0x5d   : > { %1039 = vmatmul.mubr.bf16.gmra.mrb[24].mxu1 %v444_v5  ;;  %v2523_v5 = vld [vmem:[%s3320_s3 + $0x30] ss:$8 sps:$4 sm:$0xff]  }
  0x5e   : > { %2343 = vmatprep.mubr.msk.bf16.mxu1 %vm2647_vm1, %v2646_v43 }
  0x63   : > { %1079 = vmatmul.mubr.bf16.vlgmr.msra.gmra.mrb[28].mxu0 %v404_v12  ;;  %v2534_v12 = vld [vmem:[%s3320_s3 + $0x64] ss:$8 sps:$4 sm:$0xff]  }
  0x64   : > { %1086 = vmatprep.mubr.bf16.mxu0 %v412_v13  ;;  %1351 = vmatpush1.bf16.msra.mxu0 %v2514_v63  ;;  %v2537_v13 = vld [vmem:[%s3320_s3 + $0x74] ss:$8 sps:$4 sm:$0xff]  }
  0x65   : > { %2344 = vmatmul.mubr.msk.bf16.vlgmr.msra.gmra.mrb[28].mxu1 %vm848_vm0, %v406_v14  ;;  %v2535_v14 = vld [vmem:[%s3320_s3 + $0x70] ss:$8 sps:$4 sm:$0xff]  }
  0x66   : > { %2347 = vmatprep.mubr.msk.bf16.mxu1 %vm2647_vm1, %v2646_v43  ;;  %2284 = vmatpush3.bf16.msra.mxu1 %v2539_v17 }
  0x67   : > { %2285 = vmatprep.subr.bf16.mxu1 %v2540_v18 }
  0x6b   : > { %1087 = vmatmul.mubr.bf16.gmra.mrb[32].mxu0 %v411_v19  ;;  %v2541_v19 = vld [vmem:[%s3322_s5 + $0x8] sm:$0xff]  }
  0x6c   : > { %1094 = vmatprep.mubr.bf16.mxu0 %v419_v22  ;;  %2286 = vmatpush3.bf16.msra.mxu1 %v2541_v19  ;;  %v2544_v22 = vld [vmem:[%s3322_s5 + $0x58] sm:$0xff]  }
  0x6d   : > { %2348 = vmatmul.mubr.msk.bf16.gmra.mrb[32].mxu1 %vm848_vm0, %v413_v23  ;;  %2287 = vmatprep.subr.bf16.mxu1 %v2542_v20 }
  0x6e   : > { %2351 = vmatprep.mubr.msk.bf16.mxu1 %vm2647_vm1, %v2646_v43 }
  0x70   : > { %2288 = vmatpush3.bf16.msra.mxu1 %v2543_v21 }
  0x71   : > { %2289 = vmatprep.subr.bf16.mxu1 %v2544_v22 }
  0x73   : > { %1095 = vmatmul.mubr.bf16.gmra.mrb[36].mxu0 %v418_v28 }
  0x74   : > { %1102 = vmatprep.mubr.bf16.mxu0 %v426_v31  ;;  %2290 = vmatpush3.bf16.msra.mxu1 %v2545_v26 }
  0x75   : > { %2352 = vmatmul.mubr.msk.bf16.gmra.mrb[36].mxu1 %vm848_vm0, %v420_v32  ;;  %2291 = vmatprep.subr.bf16.mxu1 %v2546_v29 }
  0x76   : > { %2355 = vmatprep.mubr.msk.bf16.mxu1 %vm2647_vm1, %v2646_v43 }
  0x7b   : > { %1103 = vmatmul.mubr.bf16.gmra.mrb[40].mxu0 %v425_v37  ;;  %v2547_v37 = vld [vmem:[%s3322_s5 + $0x20] sm:$0xff]  }
  0x7c   : > { %1110 = vmatprep.mubr.bf16.mxu0 %v433_v40  ;;  %v2548_v40 = vld [vmem:[%s3322_s5 + $0x68] sm:$0xff]   ;;  %2292 = vmatpush3.bf16.msra.mxu1 %v2547_v37 }
  0x7d   : > { %2356 = vmatmul.mubr.msk.bf16.gmra.mrb[40].mxu1 %vm848_vm0, %v427_v41  ;;  %2293 = vmatprep.subr.bf16.mxu1 %v2548_v40 }
  0x7e   : > { %2359 = vmatprep.mubr.msk.bf16.mxu1 %vm2647_vm1, %v2646_v43 }
  0x83   : > { %1111 = vmatmul.mubr.bf16.gmra.mrb[44].mxu0 %v432_v47  ;;  %v2549_v47 = vld [vmem:[%s3322_s5 + $0x28] sm:$0xff]  }
  0x84   : > { %1118 = vmatprep.mubr.bf16.mxu0 %v440_v50  ;;  %v2550_v50 = vld [vmem:[%s3322_s5 + $0x70] sm:$0xff]   ;;  %2294 = vmatpush3.bf16.msra.mxu1 %v2549_v47 }
  0x85   : > { %2360 = vmatmul.mubr.msk.bf16.gmra.mrb[44].mxu1 %vm848_vm0, %v434_v51  ;;  %2295 = vmatprep.subr.bf16.mxu1 %v2550_v50 }
  0x86   : > { %2363 = vmatprep.mubr.msk.bf16.mxu1 %vm2647_vm1, %v2646_v43 }
  0x8b   : > { %1119 = vmatmul.mubr.bf16.gmra.mrb[48].mxu0 %v439_v55 }
  0x8c   : > { %1126 = vmatprep.mubr.bf16.mxu0 %v447_v58  ;;  %v2551_v58 = vld [vmem:[%s3322_s5 + $0x30] sm:$0xff]  }
  0x8d   : > { %2364 = vmatmul.mubr.msk.bf16.gmra.mrb[48].mxu1 %vm848_vm0, %v441_v59 }
  0x8e   : > { %2367 = vmatprep.mubr.msk.bf16.mxu1 %vm2647_vm1, %v2646_v43  ;;  %v2519_v43 = vld [vmem:[%s3320_s3 + $0x14] ss:$8 sps:$4 sm:$0xff]   ;;  %2296 = vmatpush3.bf16.msra.mxu1 %v2551_v58 }
  0x8f   : > { %1352 = vmatprep.subr.bf16.mxu0 %v2519_v43 }
  0x90   : > { %1353 = vmatpush1.bf16.msra.mxu0 %v2517_v2 }
  0x91   : > { %1354 = vmatprep.subr.bf16.mxu0 %v2522_v4 }
  0x93   : > { %1127 = vmatmul.mubr.bf16.gmra.mrb[52].mxu0 %v446_v61 }
  0x94   : > { %1355 = vmatpush1.bf16.msra.mxu0 %v2520_v3  ;;  %1382 = vmatprep.mubr.bf16.mxu0 %v2648_v15 }
  0x95   : > { %2368 = vmatmul.mubr.msk.bf16.gmra.mrb[52].mxu1 %vm848_vm0, %v448_v1  ;;  %1356 = vmatprep.subr.bf16.mxu0 %v2525_v6 }
  0x98   : > { %1357 = vmatpush1.bf16.msra.mxu0 %v2523_v5 }
  0x99   : > { %1358 = vmatprep.subr.bf16.mxu0 %v2528_v8 }
  0x9c   : > { %1359 = vmatpush1.bf16.msra.mxu0 %v2526_v7 }
  0x9d   : > { %1360 = vmatprep.subr.bf16.mxu0 %v2531_v10 }
  0xa0   : > { %1361 = vmatpush1.bf16.msra.mxu0 %v2529_v9 }
  0xa1   : > { %1362 = vmatprep.subr.bf16.mxu0 %v2534_v12 }
  0xa4   : > { %1363 = vmatpush1.bf16.msra.mxu0 %v2532_v11 }
  0xa5   : > { %1364 = vmatprep.subr.bf16.mxu0 %v2537_v13 }
  0xa8   : > { %1365 = vmatpush1.bf16.msra.mxu0 %v2535_v14 }
  0xfe   : > { %v2117_v23 = vpop.f32.mrb[0].mxu0 }
  0xff   : > { %v2118_v25 = vpop.f32.mrb[1].mxu0 }
 0x100   : > { %v2119_v27 = vadd.f32 %v2118_v25, %v2117_v23  ;;  %v2120_v28 = vpop.f32.mrb[2].mxu0  ;;  %v2175_v30 = vpop.f32.mrb[0].mxu1 }
 0x101   : > { %v2121_v31 = vpop.f32.mrb[3].mxu0  ;;  %v2176_v34 = vpop.f32.mrb[1].mxu1 }
 0x102   : > { %v905_v32 = vadd.f32 %v2119_v27, %v3061_v24  ;;  %v2122_v33 = vadd.f32 %v2121_v31, %v2120_v28  ;;  %v2177_v35 = vadd.f32 %v2176_v34, %v2175_v30  ;;  %v2178_v36 = vpop.f32.mrb[2].mxu1 }
 0x103   : > { %v2179_v39 = vpop.f32.mrb[3].mxu1 }
 0x104   : > { %v908_v38 = vadd.f32 %v2122_v33, %v3061_v24  ;;  %v3077_v41 = vadd.f32 %v2177_v35, %v905_v32  ;;  %v2180_v42 = vadd.f32 %v2179_v39, %v2178_v36 }
 0x106   : > { %v2123_v44 = vpop.f32.mrb[4].mxu0  ;;  %v3079_v45 = vadd.f32 %v2180_v42, %v908_v38 }
 0x107   : > { %v2124_v46 = vpop.f32.mrb[5].mxu0 }
 0x108   : > { %v2125_v48 = vadd.f32 %v2124_v46, %v2123_v44  ;;  %v2126_v49 = vpop.f32.mrb[6].mxu0  ;;  %v2181_v51 = vpop.f32.mrb[4].mxu1 }
 0x109   : > { %v2127_v52 = vpop.f32.mrb[7].mxu0  ;;  %v2182_v55 = vpop.f32.mrb[5].mxu1 }
 0x10a   : > { %v913_v53 = vadd.f32 %v2125_v48, %v3061_v24  ;;  %v2128_v54 = vadd.f32 %v2127_v52, %v2126_v49  ;;  %v2183_v56 = vadd.f32 %v2182_v55, %v2181_v51  ;;  %v2184_v57 = vpop.f32.mrb[6].mxu1 }
 0x10b   : > { %v2185_v60 = vpop.f32.mrb[7].mxu1 }
 0x10c   : > { %v916_v59 = vadd.f32 %v2128_v54, %v3061_v24  ;;  %v3092_v61 = vadd.f32 %v2183_v56, %v913_v53  ;;  %v2186_v62 = vadd.f32 %v2185_v60, %v2184_v57 }
 0x10e   : > { %v2129_v63 = vpop.f32.mrb[8].mxu0  ;;  %v3094_v0 = vadd.f32 %v2186_v62, %v916_v59 }
 0x10f   : > { %v2130_v1 = vpop.f32.mrb[9].mxu0 }
 0x110   : > { %v2131_v2 = vadd.f32 %v2130_v1, %v2129_v63  ;;  %v2132_v43 = vpop.f32.mrb[10].mxu0  ;;  %v2187_v3 = vpop.f32.mrb[8].mxu1 }
 0x111   : > { %v2133_v4 = vpop.f32.mrb[11].mxu0  ;;  %v2188_v7 = vpop.f32.mrb[9].mxu1 }
 0x112   : > { %v921_v5 = vadd.f32 %v2131_v2, %v3061_v24  ;;  %v2134_v6 = vadd.f32 %v2133_v4, %v2132_v43  ;;  %v2189_v8 = vadd.f32 %v2188_v7, %v2187_v3  ;;  %v2190_v9 = vpop.f32.mrb[10].mxu1 }
 0x113   : > { %v2191_v11 = vpop.f32.mrb[11].mxu1 }
 0x114   : > { %v924_v10 = vadd.f32 %v2134_v6, %v3061_v24  ;;  %v3098_v12 = vadd.f32 %v2189_v8, %v921_v5  ;;  %v2192_v13 = vadd.f32 %v2191_v11, %v2190_v9 }
 0x116   : > { %v2135_v14 = vpop.f32.mrb[12].mxu0  ;;  %v3100_v16 = vadd.f32 %v2192_v13, %v924_v10 }
 0x117   : > { %v2136_v17 = vpop.f32.mrb[13].mxu0 }
 0x118   : > { %v2137_v18 = vadd.f32 %v2136_v17, %v2135_v14  ;;  %v2138_v19 = vpop.f32.mrb[14].mxu0  ;;  %v2193_v20 = vpop.f32.mrb[12].mxu1 }
 0x119   : > { %v2139_v21 = vpop.f32.mrb[15].mxu0  ;;  %v2194_v25 = vpop.f32.mrb[13].mxu1 }
 0x11a   : > { %v929_v22 = vadd.f32 %v2137_v18, %v3061_v24  ;;  %v2140_v23 = vadd.f32 %v2139_v21, %v2138_v19  ;;  %v2195_v26 = vadd.f32 %v2194_v25, %v2193_v20  ;;  %v2196_v27 = vpop.f32.mrb[14].mxu1 }
 0x11b   : > { %v2197_v29 = vpop.f32.mrb[15].mxu1 }
 0x11c   : > { %v932_v28 = vadd.f32 %v2140_v23, %v3061_v24  ;;  %v3104_v30 = vadd.f32 %v2195_v26, %v929_v22  ;;  %v2198_v31 = vadd.f32 %v2197_v29, %v2196_v27 }
 0x11e   : > { %v2141_v32 = vpop.f32.mrb[16].mxu0  ;;  %v3106_v33 = vadd.f32 %v2198_v31, %v932_v28 }
 0x11f   : > { %v2142_v34 = vpop.f32.mrb[17].mxu0 }
 0x120   : > { %v2143_v35 = vadd.f32 %v2142_v34, %v2141_v32  ;;  %v2144_v36 = vpop.f32.mrb[18].mxu0  ;;  %v2199_v37 = vpop.f32.mrb[16].mxu1 }
 0x121   : > { %v2145_v38 = vpop.f32.mrb[19].mxu0  ;;  %v2200_v42 = vpop.f32.mrb[17].mxu1 }
 0x122   : > { %v937_v39 = vadd.f32 %v2143_v35, %v3061_v24  ;;  %v2146_v40 = vadd.f32 %v2145_v38, %v2144_v36  ;;  %v2201_v44 = vadd.f32 %v2200_v42, %v2199_v37  ;;  %v2202_v46 = vpop.f32.mrb[18].mxu1 }
 0x123   : > { %v2203_v48 = vpop.f32.mrb[19].mxu1 }
 0x124   : > { %v940_v47 = vadd.f32 %v2146_v40, %v3061_v24  ;;  %v3110_v49 = vadd.f32 %v2201_v44, %v937_v39  ;;  %v2204_v50 = vadd.f32 %v2203_v48, %v2202_v46 }
 0x126   : > { %v2147_v51 = vpop.f32.mrb[20].mxu0  ;;  %v3112_v52 = vadd.f32 %v2204_v50, %v940_v47 }
 0x127   : > { %v2148_v53 = vpop.f32.mrb[21].mxu0 }
 0x128   : > { %v2149_v54 = vadd.f32 %v2148_v53, %v2147_v51  ;;  %v2150_v55 = vpop.f32.mrb[22].mxu0  ;;  %v2205_v56 = vpop.f32.mrb[20].mxu1 }
 0x129   : > { %v2151_v57 = vpop.f32.mrb[23].mxu0  ;;  %v2206_v60 = vpop.f32.mrb[21].mxu1 }
 0x12a   : > { %v945_v58 = vadd.f32 %v2149_v54, %v3061_v24  ;;  %v2152_v59 = vadd.f32 %v2151_v57, %v2150_v55  ;;  %v2207_v62 = vadd.f32 %v2206_v60, %v2205_v56  ;;  %v2208_v63 = vpop.f32.mrb[22].mxu1 }
 0x12b   : > { %v2209_v2 = vpop.f32.mrb[23].mxu1 }
 0x12c   : > { %v948_v1 = vadd.f32 %v2152_v59, %v3061_v24  ;;  %v3116_v43 = vadd.f32 %v2207_v62, %v945_v58  ;;  %v2210_v3 = vadd.f32 %v2209_v2, %v2208_v63 }
 0x12e   : > { %v2153_v4 = vpop.f32.mrb[24].mxu0  ;;  %v3118_v5 = vadd.f32 %v2210_v3, %v948_v1 }
 0x12f   : > { %v2154_v6 = vpop.f32.mrb[25].mxu0 }
 0x130   : > { %v2155_v7 = vadd.f32 %v2154_v6, %v2153_v4  ;;  %v2156_v8 = vpop.f32.mrb[26].mxu0  ;;  %v2211_v9 = vpop.f32.mrb[24].mxu1 }
 0x131   : > { %v2157_v10 = vpop.f32.mrb[27].mxu0  ;;  %v2212_v13 = vpop.f32.mrb[25].mxu1 }
 0x132   : > { %v953_v11 = vadd.f32 %v2155_v7, %v3061_v24  ;;  %v2213_v14 = vadd.f32 %v2212_v13, %v2211_v9  ;;  %v2214_v17 = vpop.f32.mrb[26].mxu1 }
 0x133   : > { %v2215_v18 = vpop.f32.mrb[27].mxu1 }
 0x134   : > { %v3121_v19 = vadd.f32 %v2213_v14, %v953_v11 }
 0x136   : > { %v2233_v20 = vpop.f32.mrb[28].mxu0 }
 0x137   : > { %v2234_v21 = vpop.f32.mrb[29].mxu0 }
 0x138   : > { %v2235_v22 = vadd.f32 %v2234_v21, %v2233_v20  ;;  %v2236_v23 = vpop.f32.mrb[30].mxu0  ;;  %v1168_v26 = vpop.f32.mrb[28].mxu1 }
 0x139   : > { %v2237_v25 = vpop.f32.mrb[31].mxu0  ;;  %v2345_v29 = vpop.f32.mrb[29].mxu1 }
 0x13a   : > { %v2238_v27 = vadd.f32 %v2237_v25, %v2236_v23  ;;  %v1081_v28 = vadd.f32 %v2235_v22, %v3077_v41  ;;  %v1171_v31 = vpop.f32.mrb[30].mxu1 }
 0x13b   : > { %v2346_v34 = vpop.f32.mrb[31].mxu1 }
 0x13c   : > { %v1169_v32 = vadd.f32 %v1168_v26, %v1081_v28  ;;  %v1084_v24 = vadd.f32 %v2238_v27, %v3079_v45 }
 0x13e   : > { %v1172_v35 = vadd.f32 %v1171_v31, %v1084_v24  ;;  %v2239_v36 = vpop.f32.mrb[32].mxu0  ;;  %v1222_v38 = vmax.f32 %v1169_v32, 0.0 }
 0x13f   : > { %v2240_v37 = vpop.f32.mrb[33].mxu0 }
 0x140   : > { %v1223_v39 = vmax.f32 %v1172_v35, 0.0  ;;  %v2241_v40 = vadd.f32 %v2240_v37, %v2239_v36  ;;  %v2242_v42 = vpop.f32.mrb[34].mxu0  ;;  %v1176_v46 = vpop.f32.mrb[32].mxu1 }
 0x141   : > { %v2243_v44 = vpop.f32.mrb[35].mxu0  ;;  %v2349_v41 = vpop.f32.mrb[33].mxu1 }
 0x142   : > { %v1235_v47 = vpack.c.bf16 %v1223_v39, %v1222_v38  ;;  %v2244_v48 = vadd.f32 %v2243_v44, %v2242_v42  ;;  %v1089_v50 = vadd.f32 %v2241_v40, %v3092_v61  ;;  %v1179_v51 = vpop.f32.mrb[34].mxu1 }
 0x143   : > { %v2350_v45 = vpop.f32.mrb[35].mxu1 }
 0x144   : > { %v1177_v53 = vadd.f32 %v1176_v46, %v1089_v50  ;;  %v1092_v54 = vadd.f32 %v2244_v48, %v3094_v0  ;;  %1383 = vmatmul.mubr.bf16.vlgmr.msra.gmra.mrb[56].mxu0 %v1235_v47 }
 0x145   : > { %1392 = vmatprep.mubr.bf16.mxu0 %v2648_v15 }
 0x146   : > { %v1180_v55 = vadd.f32 %v1179_v51, %v1092_v54  ;;  %v2245_v56 = vpop.f32.mrb[36].mxu0  ;;  %v1224_v58 = vmax.f32 %v1177_v53, 0.0 }
 0x147   : > { %v2246_v57 = vpop.f32.mrb[37].mxu0 }
 0x148   : > { %v1225_v59 = vmax.f32 %v1180_v55, 0.0  ;;  %v2247_v60 = vadd.f32 %v2246_v57, %v2245_v56  ;;  %v2248_v62 = vpop.f32.mrb[38].mxu0  ;;  %v1184_v1 = vpop.f32.mrb[36].mxu1 }
 0x149   : > { %v2249_v63 = vpop.f32.mrb[39].mxu0  ;;  %v2353_v4 = vpop.f32.mrb[37].mxu1 }
 0x14a   : > { %v1236_v2 = vpack.c.bf16 %v1225_v59, %v1224_v58  ;;  %v2250_v61 = vadd.f32 %v2249_v63, %v2248_v62  ;;  %v1097_v3 = vadd.f32 %v2247_v60, %v3098_v12  ;;  %v1187_v6 = vpop.f32.mrb[38].mxu1 }
 0x14b   : > { %v2354_v8 = vpop.f32.mrb[39].mxu1 }
 0x14c   : > { %v1185_v0 = vadd.f32 %v1184_v1, %v1097_v3  ;;  %v1100_v7 = vadd.f32 %v2250_v61, %v3100_v16  ;;  %1393 = vmatmul.mubr.bf16.gmra.mrb[60].mxu0 %v1236_v2 }
 0x14d   : > { %1402 = vmatprep.mubr.bf16.mxu0 %v2648_v15 }
 0x14e   : > { %v1188_v9 = vadd.f32 %v1187_v6, %v1100_v7  ;;  %v2251_v10 = vpop.f32.mrb[40].mxu0  ;;  %v1226_v13 = vmax.f32 %v1185_v0, 0.0 }
 0x14f   : > { %v2252_v11 = vpop.f32.mrb[41].mxu0 }
 0x150   : > { %v1227_v14 = vmax.f32 %v1188_v9, 0.0  ;;  %v2253_v17 = vadd.f32 %v2252_v11, %v2251_v10  ;;  %v2254_v18 = vpop.f32.mrb[42].mxu0  ;;  %v1192_v21 = vpop.f32.mrb[40].mxu1 }
 0x151   : > { %v2255_v20 = vpop.f32.mrb[43].mxu0  ;;  %v2357_v25 = vpop.f32.mrb[41].mxu1 }
 0x152   : > { %v1237_v22 = vpack.c.bf16 %v1227_v14, %v1226_v13  ;;  %v2256_v12 = vadd.f32 %v2255_v20, %v2254_v18  ;;  %v1105_v23 = vadd.f32 %v2253_v17, %v3104_v30  ;;  %v1195_v26 = vpop.f32.mrb[42].mxu1  ;;  %v2552_v18 = vld [vmem:[%s3322_s5 + $0x78] sm:$0xff]  }
 0x153   : > { %v2358_v28 = vpop.f32.mrb[43].mxu1  ;;  %v2553_v20 = vld [vmem:[%s3322_s5 + $0x38] sm:$0xff]   ;;  %2297 = vmatprep.subr.bf16.mxu1 %v2552_v18 }
 0x154   : > { %v1193_v16 = vadd.f32 %v1192_v21, %v1105_v23  ;;  %v1108_v27 = vadd.f32 %v2256_v12, %v3106_v33  ;;  %1403 = vmatmul.mubr.bf16.gmra.mrb[64].mxu0 %v1237_v22  ;;  %2298 = vmatpush3.bf16.msra.mxu1 %v2553_v20 }
 0x155   : > { %1412 = vmatprep.mubr.bf16.mxu0 %v2648_v15 }
 0x156   : > { %v1196_v29 = vadd.f32 %v1195_v26, %v1108_v27  ;;  %v2257_v31 = vpop.f32.mrb[44].mxu0  ;;  %v1228_v24 = vmax.f32 %v1193_v16, 0.0 }
 0x157   : > { %v2258_v32 = vpop.f32.mrb[45].mxu0 }
 0x158   : > { %v1229_v34 = vmax.f32 %v1196_v29, 0.0  ;;  %v2259_v35 = vadd.f32 %v2258_v32, %v2257_v31  ;;  %v2260_v36 = vpop.f32.mrb[46].mxu0  ;;  %v1200_v38 = vpop.f32.mrb[44].mxu1 }
 0x159   : > { %v2261_v37 = vpop.f32.mrb[47].mxu0  ;;  %v2361_v42 = vpop.f32.mrb[45].mxu1 }
 0x15a   : > { %v1238_v39 = vpack.c.bf16 %v1229_v34, %v1228_v24  ;;  %v2262_v30 = vadd.f32 %v2261_v37, %v2260_v36  ;;  %v1113_v40 = vadd.f32 %v2259_v35, %v3110_v49  ;;  %v1203_v44 = vpop.f32.mrb[46].mxu1 }
 0x15b   : > { %v2362_v47 = vpop.f32.mrb[47].mxu1 }
 0x15c   : > { %v1201_v33 = vadd.f32 %v1200_v38, %v1113_v40  ;;  %v1116_v46 = vadd.f32 %v2262_v30, %v3112_v52  ;;  %1413 = vmatmul.mubr.bf16.gmra.mrb[68].mxu0 %v1238_v39 }
 0x15d   : > { %1422 = vmatprep.mubr.bf16.mxu0 %v2648_v15 }
 0x15e   : > { %v1204_v48 = vadd.f32 %v1203_v44, %v1116_v46  ;;  %v2263_v50 = vpop.f32.mrb[48].mxu0  ;;  %v1230_v51 = vmax.f32 %v1201_v33, 0.0 }
 0x15f   : > { %v2264_v41 = vpop.f32.mrb[49].mxu0 }
 0x160   : > { %v1231_v53 = vmax.f32 %v1204_v48, 0.0  ;;  %v2265_v54 = vadd.f32 %v2264_v41, %v2263_v50  ;;  %v2266_v45 = vpop.f32.mrb[50].mxu0  ;;  %v1208_v56 = vpop.f32.mrb[48].mxu1 }
 0x161   : > { %v2267_v55 = vpop.f32.mrb[51].mxu0  ;;  %v2365_v59 = vpop.f32.mrb[49].mxu1 }
 0x162   : > { %v1239_v57 = vpack.c.bf16 %v1231_v53, %v1230_v51  ;;  %v2268_v49 = vadd.f32 %v2267_v55, %v2266_v45  ;;  %v1121_v58 = vadd.f32 %v2265_v54, %v3116_v43  ;;  %v1211_v60 = vpop.f32.mrb[50].mxu1 }
 0x163   : > { %v2366_v63 = vpop.f32.mrb[51].mxu1 }
 0x164   : > { %v1209_v52 = vadd.f32 %v1208_v56, %v1121_v58  ;;  %v1124_v62 = vadd.f32 %v2268_v49, %v3118_v5  ;;  %1423 = vmatmul.mubr.bf16.gmra.mrb[72].mxu0 %v1239_v57 }
 0x165   : > { %1432 = vmatprep.mubr.bf16.mxu0 %v2648_v15 }
 0x166   : > { %v1212_v1 = vadd.f32 %v1211_v60, %v1124_v62  ;;  %v2269_v2 = vpop.f32.mrb[52].mxu0  ;;  %v1232_v3 = vmax.f32 %v1209_v52, 0.0 }
 0x167   : > { %v2270_v61 = vpop.f32.mrb[53].mxu0 }
 0x168   : > { %v1233_v4 = vmax.f32 %v1212_v1, 0.0  ;;  %v2271_v6 = vadd.f32 %v2270_v61, %v2269_v2  ;;  %v2272_v0 = vpop.f32.mrb[54].mxu0  ;;  %v1216_v8 = vpop.f32.mrb[52].mxu1 }
 0x169   : > { %v2273_v7 = vpop.f32.mrb[55].mxu0  ;;  %v2369_v10 = vpop.f32.mrb[53].mxu1 }
 0x16a   : > { %v1240_v9 = vpack.c.bf16 %v1233_v4, %v1232_v3  ;;  %v1129_v43 = vadd.f32 %v2271_v6, %v3121_v19  ;;  %v1219_v11 = vpop.f32.mrb[54].mxu1  ;;  %v1260_v19 = vlaneseq }
 0x16b   : > { %v2370_v5 = vpop.f32.mrb[55].mxu1 }
 0x16c   : > { %v1217_v13 = vadd.f32 %v1216_v8, %v1129_v43  ;;  %1433 = vmatmul.mubr.bf16.gmra.mrb[76].mxu0 %v1240_v9  ;;  %v1261_v21 = vshrl.u32 %v1260_v19, 7 }
 0x16d   : > { %1442 = vmatprep.mubr.bf16.mxu0 %v2648_v15  ;;  %v1258_v15 = vld [vmem:[%s3321_s4] sm:$0x3] }
 0x16e   : > { %v1234_v14 = vmax.f32 %v1217_v13, 0.0  ;;  %v1262_v22 = vsub.s32 0, %v1261_v21  ;;  %v1266_v12 = vsub.s32 1, %v1261_v21 }
 0x170   : > { %v1241_v17 = vpack.c.bf16 %v1234_v14, %v1234_v14  ;;  %v3151_v23 = vrot.slane %v1258_v15, %v1262_v22  ;;  %v3153_v25 = vrot.slane %v1258_v15, %v1266_v12 }
 0x174   : > { %1443 = vmatmul.mubr.bf16.gmra.mrb[80].mxu0 %v1241_v17 }
 0x217   : > { %v1384_v26 = vpop.f32.mrb[56].mxu0 }
 0x218   : > { %v1385_v16 = vadd.f32 %v1384_v26, %v3151_v23  ;;  %v1386_v27 = vpop.f32.mrb[57].mxu0 }
 0x219   : > { %v1387_v28 = vadd.f32 %v1386_v27, %v3153_v25  ;;  %v1388_v29 = vpop.f32.mrb[58].mxu0 }
 0x21a   : > { %v1389_v31 = vadd.f32 %v1388_v29, %v3151_v23  ;;  %v1390_v32 = vpop.f32.mrb[59].mxu0  ;;  %v1451_v34 = vmax.f32 %v1385_v16, 0.0 }
 0x21b   : > { %v1391_v24 = vadd.f32 %v1390_v32, %v3153_v25  ;;  %v1452_v36 = vmax.f32 %v1387_v28, 0.0 }
 0x21c   : > { %v1453_v35 = vmax.f32 %v1389_v31, 0.0 }
 0x21d   : > { %v1454_v37 = vmax.f32 %v1391_v24, 0.0 }
 0x21e   : > { %v1477_v38 = vpack.c.bf16 %v1453_v35, %v1451_v34 }
 0x21f   : > { %v1478_v39 = vpack.c.bf16 %v1454_v37, %v1452_v36  ;;  %v1394_v30 = vpop.f32.mrb[60].mxu0 }
 0x220   : > { %v1395_v40 = vadd.f32 %v1394_v30, %v3151_v23  ;;  %v1396_v42 = vpop.f32.mrb[61].mxu0 }
 0x221   : > { %v1397_v44 = vadd.f32 %v1396_v42, %v3153_v25  ;;  %v1398_v33 = vpop.f32.mrb[62].mxu0  ;;  %1658 = vmatprep.mubr.bf16.mxu1 %v1478_v39 }
 0x222   : > { %v1399_v46 = vadd.f32 %v1398_v33, %v3151_v23  ;;  %v1400_v47 = vpop.f32.mrb[63].mxu0  ;;  %1659 = vmatmul.mubr.bf16.vlgmr.msra.gmra.mrb[56].mxu1 %v1477_v38  ;;  %v1455_v50 = vmax.f32 %v1395_v40, 0.0 }
 0x223   : > { %v1401_v48 = vadd.f32 %v1400_v47, %v3153_v25  ;;  %v1456_v51 = vmax.f32 %v1397_v44, 0.0 }
 0x224   : > { %v1457_v41 = vmax.f32 %v1399_v46, 0.0 }
 0x225   : > { %v1458_v53 = vmax.f32 %v1401_v48, 0.0 }
 0x226   : > { %v1479_v54 = vpack.c.bf16 %v1457_v41, %v1455_v50 }
 0x227   : > { %v1480_v45 = vpack.c.bf16 %v1458_v53, %v1456_v51  ;;  %v1404_v55 = vpop.f32.mrb[64].mxu0 }
 0x228   : > { %v1405_v56 = vadd.f32 %v1404_v55, %v3151_v23  ;;  %v1406_v57 = vpop.f32.mrb[65].mxu0 }
 0x229   : > { %v1407_v49 = vadd.f32 %v1406_v57, %v3153_v25  ;;  %v1408_v58 = vpop.f32.mrb[66].mxu0  ;;  %1666 = vmatprep.mubr.bf16.mxu1 %v1480_v45 }
 0x22a   : > { %v1409_v59 = vadd.f32 %v1408_v58, %v3151_v23  ;;  %v1410_v60 = vpop.f32.mrb[67].mxu0  ;;  %1667 = vmatmul.mubr.bf16.gmra.mrb[60].mxu1 %v1479_v54  ;;  %v1459_v62 = vmax.f32 %v1405_v56, 0.0 }
 0x22b   : > { %v1411_v52 = vadd.f32 %v1410_v60, %v3153_v25  ;;  %v1460_v1 = vmax.f32 %v1407_v49, 0.0 }
 0x22c   : > { %v1461_v63 = vmax.f32 %v1409_v59, 0.0 }
 0x22d   : > { %v1462_v2 = vmax.f32 %v1411_v52, 0.0 }
 0x22e   : > { %v1481_v61 = vpack.c.bf16 %v1461_v63, %v1459_v62 }
 0x22f   : > { %v1482_v3 = vpack.c.bf16 %v1462_v2, %v1460_v1  ;;  %v1414_v4 = vpop.f32.mrb[68].mxu0 }
 0x230   : > { %v1415_v6 = vadd.f32 %v1414_v4, %v3151_v23  ;;  %v1416_v0 = vpop.f32.mrb[69].mxu0 }
 0x231   : > { %v1417_v7 = vadd.f32 %v1416_v0, %v3153_v25  ;;  %v1418_v8 = vpop.f32.mrb[70].mxu0  ;;  %1674 = vmatprep.mubr.bf16.mxu1 %v1482_v3 }
 0x232   : > { %v1419_v9 = vadd.f32 %v1418_v8, %v3151_v23  ;;  %v1420_v43 = vpop.f32.mrb[71].mxu0  ;;  %1675 = vmatmul.mubr.bf16.gmra.mrb[64].mxu1 %v1481_v61  ;;  %v1463_v11 = vmax.f32 %v1415_v6, 0.0 }
 0x233   : > { %v1421_v10 = vadd.f32 %v1420_v43, %v3153_v25  ;;  %v1464_v5 = vmax.f32 %v1417_v7, 0.0 }
 0x234   : > { %v1465_v13 = vmax.f32 %v1419_v9, 0.0 }
 0x235   : > { %v1466_v14 = vmax.f32 %v1421_v10, 0.0 }
 0x236   : > { %v1483_v17 = vpack.c.bf16 %v1465_v13, %v1463_v11 }
 0x237   : > { %v1484_v18 = vpack.c.bf16 %v1466_v14, %v1464_v5  ;;  %v1424_v20 = vpop.f32.mrb[72].mxu0 }
 0x238   : > { %v1425_v19 = vadd.f32 %v1424_v20, %v3151_v23  ;;  %v1426_v21 = vpop.f32.mrb[73].mxu0 }
 0x239   : > { %v1427_v22 = vadd.f32 %v1426_v21, %v3153_v25  ;;  %v1428_v15 = vpop.f32.mrb[74].mxu0  ;;  %1682 = vmatprep.mubr.bf16.mxu1 %v1484_v18 }
 0x23a   : > { %v1429_v12 = vadd.f32 %v1428_v15, %v3151_v23  ;;  %v1430_v26 = vpop.f32.mrb[75].mxu0  ;;  %1683 = vmatmul.mubr.bf16.gmra.mrb[68].mxu1 %v1483_v17  ;;  %v1467_v27 = vmax.f32 %v1425_v19, 0.0 }
 0x23b   : > { %v1431_v16 = vadd.f32 %v1430_v26, %v3153_v25  ;;  %v1468_v29 = vmax.f32 %v1427_v22, 0.0 }
 0x23c   : > { %v1469_v28 = vmax.f32 %v1429_v12, 0.0 }
 0x23d   : > { %v1470_v31 = vmax.f32 %v1431_v16, 0.0 }
 0x23e   : > { %v1485_v32 = vpack.c.bf16 %v1469_v28, %v1467_v27 }
 0x23f   : > { %v1486_v24 = vpack.c.bf16 %v1470_v31, %v1468_v29  ;;  %v1434_v34 = vpop.f32.mrb[76].mxu0 }
 0x240   : > { %v1435_v35 = vadd.f32 %v1434_v34, %v3151_v23  ;;  %v1436_v36 = vpop.f32.mrb[77].mxu0 }
 0x241   : > { %v1437_v37 = vadd.f32 %v1436_v36, %v3153_v25  ;;  %v1438_v38 = vpop.f32.mrb[78].mxu0  ;;  %1690 = vmatprep.mubr.bf16.mxu1 %v1486_v24 }
 0x242   : > { %v1439_v39 = vadd.f32 %v1438_v38, %v3151_v23  ;;  %v1440_v30 = vpop.f32.mrb[79].mxu0  ;;  %1691 = vmatmul.mubr.bf16.gmra.mrb[72].mxu1 %v1485_v32  ;;  %v1471_v42 = vmax.f32 %v1435_v35, 0.0 }
 0x243   : > { %v1441_v40 = vadd.f32 %v1440_v30, %v3153_v25  ;;  %v1472_v33 = vmax.f32 %v1437_v37, 0.0 }
 0x244   : > { %v1473_v44 = vmax.f32 %v1439_v39, 0.0 }
 0x245   : > { %v1474_v46 = vmax.f32 %v1441_v40, 0.0 }
 0x246   : > { %v1487_v47 = vpack.c.bf16 %v1473_v44, %v1471_v42 }
 0x247   : > { %v1488_v48 = vpack.c.bf16 %v1474_v46, %v1472_v33  ;;  %v1444_v50 = vpop.f32.mrb[80].mxu0 }
 0x248   : > { %v1445_v41 = vadd.f32 %v1444_v50, %v3151_v23  ;;  %v1446_v51 = vpop.f32.mrb[81].mxu0  ;;  %v3185_v23 = vld [vmem:[%s3323_s6] ss:$0 sm:$0xff] }
 0x249   : > { %v1447_v53 = vadd.f32 %v1446_v51, %v3153_v25  ;;  %v1448_v54 = vpop.f32.mrb[82].mxu0  ;;  %1698 = vmatprep.mubr.bf16.mxu1 %v1488_v48 }
 0x24a   : > { %v1449_v45 = vpop.f32.mrb[83].mxu0  ;;  %1699 = vmatmul.mubr.bf16.gmra.mrb[76].mxu1 %v1487_v47  ;;  %v1475_v56 = vmax.f32 %v1445_v41, 0.0 }
 0x24b   : > { %v1476_v55 = vmax.f32 %v1447_v53, 0.0 }
 0x24c   : > { %v1489_v49 = vpack.c.bf16 %v1475_v56, %v1475_v56 }
 0x24d   : > { %v1490_v57 = vpack.c.bf16 %v1476_v55, %v1476_v55 }
 0x24f   : > { %1706 = vmatprep.mubr.bf16.mxu1 %v1490_v57 }
 0x252   : > { %1707 = vmatmul.mubr.bf16.gmra.mrb[80].mxu1 %v1489_v49 }
 0x2f5   : > { %v2299_v58 = vpop.f32.mrb[56].mxu1 }
 0x2f6   : > { %v2300_v59 = vpop.f32.mrb[57].mxu1 }
 0x2f7   : > { %v2301_v25 = vadd.f32 %v2300_v59, %v2299_v58  ;;  %v2302_v60 = vpop.f32.mrb[58].mxu1 }
 0x2f8   : > { %v2303_v52 = vpop.f32.mrb[59].mxu1 }
 0x2f9   : > { %v1661_v62 = vadd.f32 %v2301_v25, %v3185_v23  ;;  %v2304_v63 = vadd.f32 %v2303_v52, %v2302_v60 }
 0x2fb   : > { %1715 = vst.msk [vmem:[%s3188_s10] sm:$0xff] %vm1714_vm2, %v1661_v62  ;;  %v1664_v1 = vadd.f32 %v2304_v63, %v3185_v23 }
 0x2fd   : > { %1716 = vst.msk [vmem:[%s3188_s10 + $0x8] sm:$0xff] %vm1714_vm2, %v1664_v1  ;;  %v2305_v2 = vpop.f32.mrb[60].mxu1 }
 0x2fe   : > { %v2306_v61 = vpop.f32.mrb[61].mxu1 }
 0x2ff   : > { %v2307_v3 = vadd.f32 %v2306_v61, %v2305_v2  ;;  %v2308_v4 = vpop.f32.mrb[62].mxu1 }
 0x300   : > { %v2309_v6 = vpop.f32.mrb[63].mxu1 }
 0x301   : > { %v1669_v0 = vadd.f32 %v2307_v3, %v3185_v23  ;;  %v2310_v7 = vadd.f32 %v2309_v6, %v2308_v4 }
 0x303   : > { %1717 = vst.msk [vmem:[%s3188_s10 + $0x10] sm:$0xff] %vm1714_vm2, %v1669_v0  ;;  %v1672_v8 = vadd.f32 %v2310_v7, %v3185_v23 }
 0x305   : > { %1718 = vst.msk [vmem:[%s3188_s10 + $0x18] sm:$0xff] %vm1714_vm2, %v1672_v8  ;;  %v2311_v9 = vpop.f32.mrb[64].mxu1 }
 0x306   : > { %v2312_v43 = vpop.f32.mrb[65].mxu1 }
 0x307   : > { %v2313_v10 = vadd.f32 %v2312_v43, %v2311_v9  ;;  %v2314_v11 = vpop.f32.mrb[66].mxu1 }
 0x308   : > { %v2315_v13 = vpop.f32.mrb[67].mxu1 }
 0x309   : > { %v1677_v5 = vadd.f32 %v2313_v10, %v3185_v23  ;;  %v2316_v14 = vadd.f32 %v2315_v13, %v2314_v11 }
 0x30b   : > { %1719 = vst.msk [vmem:[%s3188_s10 + $0x20] sm:$0xff] %vm1714_vm2, %v1677_v5  ;;  %v1680_v17 = vadd.f32 %v2316_v14, %v3185_v23 }
 0x30d   : > { %1720 = vst.msk [vmem:[%s3188_s10 + $0x28] sm:$0xff] %vm1714_vm2, %v1680_v17  ;;  %v2317_v18 = vpop.f32.mrb[68].mxu1 }
 0x30e   : > { %v2318_v20 = vpop.f32.mrb[69].mxu1 }
 0x30f   : > { %v2319_v19 = vadd.f32 %v2318_v20, %v2317_v18  ;;  %v2320_v21 = vpop.f32.mrb[70].mxu1 }
 0x310   : > { %v2321_v22 = vpop.f32.mrb[71].mxu1 }
 0x311   : > { %v1685_v15 = vadd.f32 %v2319_v19, %v3185_v23  ;;  %v2322_v12 = vadd.f32 %v2321_v22, %v2320_v21 }
 0x313   : > { %1721 = vst.msk [vmem:[%s3188_s10 + $0x30] sm:$0xff] %vm1714_vm2, %v1685_v15  ;;  %v1688_v26 = vadd.f32 %v2322_v12, %v3185_v23 }
 0x315   : > { %1722 = vst.msk [vmem:[%s3188_s10 + $0x38] sm:$0xff] %vm1714_vm2, %v1688_v26  ;;  %v2323_v16 = vpop.f32.mrb[72].mxu1 }
 0x316   : > { %v2324_v27 = vpop.f32.mrb[73].mxu1 }
 0x317   : > { %v2325_v28 = vadd.f32 %v2324_v27, %v2323_v16  ;;  %v2326_v29 = vpop.f32.mrb[74].mxu1 }
 0x318   : > { %v2327_v31 = vpop.f32.mrb[75].mxu1 }
 0x319   : > { %v1693_v32 = vadd.f32 %v2325_v28, %v3185_v23  ;;  %v2328_v24 = vadd.f32 %v2327_v31, %v2326_v29 }
 0x31b   : > { %1723 = vst.msk [vmem:[%s3188_s10 + $0x40] sm:$0xff] %vm1714_vm2, %v1693_v32  ;;  %v1696_v34 = vadd.f32 %v2328_v24, %v3185_v23 }
 0x31d   : > { %1724 = vst.msk [vmem:[%s3188_s10 + $0x48] sm:$0xff] %vm1714_vm2, %v1696_v34  ;;  %v2329_v35 = vpop.f32.mrb[76].mxu1 }
 0x31e   : > { %v2330_v36 = vpop.f32.mrb[77].mxu1 }
 0x31f   : > { %v2331_v37 = vadd.f32 %v2330_v36, %v2329_v35  ;;  %v2332_v38 = vpop.f32.mrb[78].mxu1 }
 0x320   : > { %v2333_v39 = vpop.f32.mrb[79].mxu1 }
 0x321   : > { %v1701_v30 = vadd.f32 %v2331_v37, %v3185_v23  ;;  %v2334_v40 = vadd.f32 %v2333_v39, %v2332_v38 }
 0x323   : > { %1725 = vst.msk [vmem:[%s3188_s10 + $0x50] sm:$0xff] %vm1714_vm2, %v1701_v30  ;;  %v1704_v42 = vadd.f32 %v2334_v40, %v3185_v23 }
 0x325   : > { %1726 = vst.msk [vmem:[%s3188_s10 + $0x58] sm:$0xff] %vm1714_vm2, %v1704_v42  ;;  %v2335_v44 = vpop.f32.mrb[80].mxu1  ;;  %1734 = sbr.rel (!%p2714_p4) target bundleno = 873 (0x369), region = 52 }
 0x326   : > { %v2336_v33 = vpop.f32.mrb[81].mxu1 }
 0x327   : > { %v2337_v46 = vadd.f32 %v2336_v33, %v2335_v44  ;;  %v2338_v47 = vpop.f32.mrb[82].mxu1 }
 0x328   : > { %v2339_v48 = vpop.f32.mrb[83].mxu1 }
 0x329   : > { %v1709_v50 = vadd.f32 %v2337_v46, %v3185_v23 }
 0x32b   : > { %1727 = vst.msk [vmem:[%s3188_s10 + $0x60] sm:$0xff] %vm1714_vm2, %v1709_v50 }
 0x32c   : > { %s3333_s24 = smov (!%p1737_p8, %s1736_s24), 13 }
 0x32d   : > { %s2088_s15 = sshll.u32 %s3333_s24, 7 }
 0x32e   : > { %p2091_p9 = scmp.eq.s32.totalorder %s2088_s15, 0 }
 0x32f   : > { %2554 = sdivrem.u32 (!%p2091_p9), %s3333_s24, 13 }
 0x330   : > { %1745 = sbr.rel (%p2091_p9) target bundleno = 873 (0x369), region = 56 }
 0x338   : > { %s3241_s9 = spop.drf %2554 }
 0x339   : > { %p2092_p10 = scmp.le.s32.totalorder %s3241_s9, 0 }
 0x33a   : > { %s3326_s27 = smov (!%p2092_p10), %s3235_s14  ;;  %s3327_s19 = smov (!%p2092_p10), %s3188_s10 }
 0x33b   : > { %1949 = sbr.rel (%p2092_p10) target bundleno = 844 (0x34c), region = 132  ;;  %s3250_s16 = smov (!%p2092_p10), 0  }
 0x33c   : > { %s3252_s17 = smov (!%p2092_p10), 0  }
 0x342 LB: >> { %v1833_v41 = vld [vmem:[%s2620_s19] sm:$0xff]  ;;  %v1835_v51 = vld [vmem:[%s2620_s19 + $0x8] sm:$0xff]  ;;  %v1837_v53 = vld [vmem:[%s2620_s19 + $0x10] sm:$0xff]  ;;  %s1859_s18 = sadd.s32 1, %s2624_s16  ;;  %s1827_s17 = sadd.s32 1, %s2628_s17   ;;  %s2628_s17 = sphi %s3252_s17, %s1827_s17   ;;  %s2624_s16 = sphi %s3250_s16, %s3328_s16   ;;  %s2620_s19 = sphi %s3327_s19, %s1864_s19   ;;  %s2616_s27 = sphi %s3326_s27, %s1865_s27  }
 0x343   : >> { %1834 = vst [vmem:[%s2616_s27] sm:$0xff] %v1833_v41  ;;  %1836 = vst [vmem:[%s2616_s27 + $0x8] sm:$0xff] %v1835_v51  ;;  %v1839_v54 = vld [vmem:[%s2620_s19 + $0x18] sm:$0xff]  ;;  %v1841_v45 = vld [vmem:[%s2620_s19 + $0x20] sm:$0xff]  ;;  %p1860_p11 = scmp.ge.s32.totalorder %s1859_s18, %s3241_s9  ;;  %p1826_p12 = scmp.ge.s32.totalorder %s1827_s17, %s3241_s9 }
 0x344   : >> { %1838 = vst [vmem:[%s2616_s27 + $0x10] sm:$0xff] %v1837_v53  ;;  %v1843_v55 = vld [vmem:[%s2620_s19 + $0x28] sm:$0xff]  ;;  %1840 = vst [vmem:[%s2616_s27 + $0x18] sm:$0xff] %v1839_v54  ;;  %v1845_v56 = vld [vmem:[%s2620_s19 + $0x30] sm:$0xff] }
 0x345   : >> { %1842 = vst [vmem:[%s2616_s27 + $0x20] sm:$0xff] %v1841_v45  ;;  %1844 = vst [vmem:[%s2616_s27 + $0x28] sm:$0xff] %v1843_v55  ;;  %v1847_v57 = vld [vmem:[%s2620_s19 + $0x38] sm:$0xff]  ;;  %v1849_v49 = vld [vmem:[%s2620_s19 + $0x40] sm:$0xff]  ;;  %s3335_s18 = smov (%p1860_p11, %s1859_s18), 0  ;;  %1829 = sbr.rel (!%p1826_p12) target bundleno = 834 (0x342), region = 138 }
 0x346   : >> { %1846 = vst [vmem:[%s2616_s27 + $0x30] sm:$0xff] %v1845_v56  ;;  %1848 = vst [vmem:[%s2616_s27 + $0x38] sm:$0xff] %v1847_v57  ;;  %v1851_v58 = vld [vmem:[%s2620_s19 + $0x48] sm:$0xff]  ;;  %v1853_v23 = vld [vmem:[%s2620_s19 + $0x50] sm:$0xff]  ;;  %s1862_s21 = smul.u32 104, %s3335_s18  ;;  %s3328_s16 = smov %s3335_s18 }
 0x347   : >> { %1850 = vst [vmem:[%s2616_s27 + $0x40] sm:$0xff] %v1849_v49  ;;  %v1855_v59 = vld [vmem:[%s2620_s19 + $0x58] sm:$0xff]  ;;  %1852 = vst [vmem:[%s2616_s27 + $0x48] sm:$0xff] %v1851_v58  ;;  %v1857_v25 = vld [vmem:[%s2620_s19 + $0x60] sm:$0xff] }
 0x348   : >> { %1854 = vst [vmem:[%s2616_s27 + $0x50] sm:$0xff] %v1853_v23  ;;  %1856 = vst [vmem:[%s2616_s27 + $0x58] sm:$0xff] %v1855_v59  ;;  %s1864_s19 = scalar_lea.vmem %s3188_s10, %s1862_s21 [#allocation2]  }
 0x349   : >> { %1858 = vst [vmem:[%s2616_s27 + $0x60] sm:$0xff] %v1857_v25  ;;  %s1865_s27 = scalar_lea.vmem %s3235_s14, %s1862_s21  }
 0x34c PF: > { %2556 = sdivrem.u32 %s3333_s24, 13 }
 0x34d   : > { %s2093_s22 = smul.u32 104, %s3241_s9 }
 0x34f   : > { %s1870_s20 = scalar_lea.vmem %s3188_s10, %s2093_s22 [#allocation2]   ;;  %s1872_s23 = scalar_lea.vmem %s3235_s14, %s2093_s22  }
 0x355   : > { %s2557_s29 = spop.drf %2556 }
 0x356   : > { %p2095_p13 = scmp.le.s32.totalorder %s2557_s29, 0 }
 0x357   : > { %s2630_s30 = smov (!%p2095_p13), %s1872_s23   ;;  %s2634_s26 = smov (!%p2095_p13), %s1870_s20  }
 0x358   : > { %1963 = sbr.rel (%p2095_p13) target bundleno = 873 (0x369), region = 143  ;;  %s2638_s11 = smov (!%p2095_p13), 0  }
 0x359   : > { %s2642_s12 = smov (!%p2095_p13), 0  }
 0x35f LB: >> { %v1882_v60 = vld [vmem:[%s2636_s26] sm:$0xff]  ;;  %s1884_s13 = sadd.s32 1, %s2640_s11  ;;  %s1876_s12 = sadd.s32 1, %s2644_s12   ;;  %s2644_s12 = sphi %s2642_s12, %s1876_s12   ;;  %s2640_s11 = sphi %s2638_s11, %s2639_s11   ;;  %s2636_s26 = sphi %s2634_s26, %s1889_s26   ;;  %s2632_s30 = sphi %s2630_s30, %s1890_s30  }
 0x360   : >> { %1883 = vst [vmem:[%s2632_s30] sm:$0xff] %v1882_v60  ;;  %p1885_p0 = scmp.ge.s32.totalorder %s1884_s13, %s2557_s29  ;;  %p1875_p1 = scmp.ge.s32.totalorder %s1876_s12, %s2557_s29 }
 0x362   : >> { %s3337_s13 = smov (%p1885_p0, %s1884_s13), 0  ;;  %1878 = sbr.rel (!%p1875_p1) target bundleno = 863 (0x35f), region = 149 }
 0x363   : >> { %s2096_s10 = sshll.u32 %s3337_s13, 3  ;;  %s2639_s11 = smov %s3337_s13  }
 0x364   : >> { %s1889_s26 = scalar_lea.vmem %s1870_s20, %s2096_s10 [#allocation2]   ;;  %s1890_s30 = scalar_lea.vmem %s1872_s23, %s2096_s10  }
 0x369 PF: > { %p14_p2 = scmp.ge.s32.totalorder %s2704_s28, 4   ;;  %s3329_s24 = smov %s2608_s25 }
 0x36a   : > { %s3330_s25 = smov %s2712_s8  ;;  %s3331_s26 = smov %s2704_s28 }
 0x36b   :  { %16 = sbr.rel (!%p14_p2) target bundleno = 2 (0x2), region = 160 }

</bundles_post_ra>
